<compile_context>
chip_gen: v7x
topology: tpu7x:2x2x1
jax: 0.10.0
libtpu: 0.0.40
codegen_flags: <defaults>
</compile_context>

<pallas_src>
import functools
import math

import jax
import jax.numpy as jnp
from jax.experimental import pallas as pl
from jax.experimental.pallas import tpu as pltpu


# ------------------------------ shared helpers ------------------------------

def _layernorm(x, g, b, eps):
    mu = jnp.mean(x, axis=-1, keepdims=True)
    xc = x - mu
    var = jnp.mean(xc * xc, axis=-1, keepdims=True)
    return xc * jax.lax.rsqrt(var + eps) * g + b


# ---------------------------- prompt projection -----------------------------

def _linear_kernel(x_ref, w_ref, b_ref, o_ref):
    o_ref[...] = (jnp.dot(x_ref[...], w_ref[...],
                          preferred_element_type=jnp.float32) + b_ref[...])


def prompt_linear(x, w_kn_bf16, b_1n):
    """x: (M, K) f32 -> (M, N) f32; matmul operands in bf16, f32 accumulation."""
    M = x.shape[0]
    N = w_kn_bf16.shape[1]
    return pl.pallas_call(
        _linear_kernel,
        out_shape=jax.ShapeDtypeStruct((M, N), jnp.float32),
    )(x.astype(jnp.bfloat16), w_kn_bf16, b_1n)


# -------------------------------- stem kernel --------------------------------

def _stem_kernel(p_ref, w_ref, cls_ref, pos_ref, prm_ref, g_ref, b_ref, o_ref,
                 *, eps):
    """Patch-embed matmul + cls/pos add + ln_pre + shallow-prompt insertion,
    one image per program."""
    pe = jnp.dot(p_ref[0], w_ref[...],
                 preferred_element_type=jnp.float32)                     # (HW, C)
    toks = jnp.concatenate([cls_ref[...], pe + pos_ref[...]], axis=0)    # (1+HW, C)
    toks = _layernorm(toks, g_ref[...], b_ref[...], eps)
    # Prompts are inserted AFTER ln_pre and are NOT normalized (as in reference).
    o_ref[0] = jnp.concatenate([toks[:1, :], prm_ref[...], toks[1:, :]], axis=0)


def stem(patches_bf16, cls_row, pos_sp, shallow_prm, params, cfg, hw):
    B, _, K = patches_bf16.shape
    C = cfg["width"]
    nt = cfg["num_tokens"]
    L = 1 + nt + hw
    grid_spec = pltpu.PrefetchScalarGridSpec(
        num_scalar_prefetch=0,
        grid=(B,),
        in_specs=[
            pl.BlockSpec((1, hw, K), lambda b: (b, 0, 0)),   # patches (bf16)
            pl.BlockSpec((K, C), lambda b: (0, 0)),          # conv weight (bf16)
            pl.BlockSpec((1, C), lambda b: (0, 0)),          # cls row (pos0 + 2*cls)
            pl.BlockSpec((hw, C), lambda b: (0, 0)),         # spatial pos embed
            pl.BlockSpec((nt, C), lambda b: (0, 0)),         # projected shallow prompts
            pl.BlockSpec((1, C), lambda b: (0, 0)),          # ln_pre gamma
            pl.BlockSpec((1, C), lambda b: (0, 0)),          # ln_pre beta
        ],
        out_specs=pl.BlockSpec((1, L, C), lambda b: (b, 0, 0)),
    )
    return pl.pallas_call(
        functools.partial(_stem_kernel, eps=1e-5),
        grid_spec=grid_spec,
        out_shape=jax.ShapeDtypeStruct((B, L, C), jnp.float32),
        compiler_params=pltpu.CompilerParams(
            dimension_semantics=("parallel",),
            vmem_limit_bytes=48 * 1024 * 1024),
    )(patches_bf16, params["conv1_w_kn"], cls_row, pos_sp, shallow_prm,
      params["ln_pre_g"], params["ln_pre_b"])


# --------------------------- fused transformer kernel ------------------------

def _transformer_kernel(x0_ref, dp_ref,
                        ln1g_ref, ln1b_ref, wqkv_ref, bqkv_ref,
                        wo_ref, bo_ref, ln2g_ref, ln2b_ref,
                        wfc_ref, bfc_ref, wcp_ref, bcp_ref,
                        hid_ref, feat_ref,
                        *, heads, num_tokens, hw, eps):
    """One CLIP ResidualAttentionBlock for one image per grid step.  The
    residual stream lives in the (resident) hid_ref output block across the
    whole layer axis; per-layer weights are pipelined by their BlockSpecs."""
    l = pl.program_id(1)

    @pl.when(l == 0)
    def _():
        hid_ref[...] = x0_ref[...]            # initialize residual stream

    x = hid_ref[0]                            # (L, C) f32, resident in VMEM
    C = x.shape[-1]
    Dh = C // heads
    scale = Dh ** -0.5

    # Prompt insertion for this layer: slot 0 of dp_ref is the shallow prompts
    # already present in x0 (no-op), slot l>0 is deep_prompt_embeddings[l-1].
    x = jnp.concatenate([x[:1, :], dp_ref[0], x[1 + num_tokens:, :]], axis=0)

    # ---- attention branch (per-image; no cross-batch mask needed) ----
    y = _layernorm(x, ln1g_ref[0], ln1b_ref[0], eps)
    qkv = (jnp.dot(y.astype(jnp.bfloat16), wqkv_ref[0],
                   preferred_element_type=jnp.float32) + bqkv_ref[0])   # (L, 3C)

    head_outs = []
    # NOTE: at ViT-B scale (Dh=64) these lane slices straddle the 128-lane tile;
    # reordering QKV weight columns into 128-wide head pairs would avoid relayouts.
    for h in range(heads):                    # static unroll, heads is small
        qh = qkv[:, h * Dh:(h + 1) * Dh].astype(jnp.bfloat16)
        kh = qkv[:, C + h * Dh:C + (h + 1) * Dh].astype(jnp.bfloat16)
        vh = qkv[:, 2 * C + h * Dh:2 * C + (h + 1) * Dh].astype(jnp.bfloat16)
        s = jax.lax.dot_general(qh, kh, (((1,), (1,)), ((), ())),
                                preferred_element_type=jnp.float32)     # (L, L)
        s = s * scale
        s = s - jnp.max(s, axis=-1, keepdims=True)
        p = jnp.exp(s)
        p = p * pl.reciprocal(jnp.sum(p, axis=-1, keepdims=True), approx=True)
        head_outs.append(jnp.dot(p.astype(jnp.bfloat16), vh,
                                 preferred_element_type=jnp.float32))   # (L, Dh)
    attn = jnp.concatenate(head_outs, axis=-1)                          # (L, C)
    # Single fused out-projection (K = C) instead of `heads` skinny matmuls.
    attn = (jnp.dot(attn.astype(jnp.bfloat16), wo_ref[0],
                    preferred_element_type=jnp.float32) + bo_ref[0])
    x = x + attn

    # ---- MLP branch (QuickGELU) ----
    z = _layernorm(x, ln2g_ref[0], ln2b_ref[0], eps)
    h1 = (jnp.dot(z.astype(jnp.bfloat16), wfc_ref[0],
                  preferred_element_type=jnp.float32) + bfc_ref[0])
    h1 = h1 * jax.nn.sigmoid(1.702 * h1)
    h2 = (jnp.dot(h1.astype(jnp.bfloat16), wcp_ref[0],
                  preferred_element_type=jnp.float32) + bcp_ref[0])
    x = x + h2

    hid_ref[0] = x                            # residual stream stays resident
    feat_ref[0, 0] = x[1 + num_tokens:, :]    # per-layer patch-token features


def fused_transformer(x0, dp_all, params, cfg, hw):
    B, L, C = x0.shape
    layers = cfg["layers"]
    heads = cfg["heads"]
    nt = cfg["num_tokens"]
    C3, C4 = 3 * C, 4 * C

    def wspec(k, n):
        return pl.BlockSpec((1, k, n), lambda b, l: (l, 0, 0))

    grid_spec = pltpu.PrefetchScalarGridSpec(
        num_scalar_prefetch=0,
        grid=(B, layers),
        in_specs=[
            pl.BlockSpec((1, L, C), lambda b, l: (b, 0, 0)),   # x0 (resident per b)
            wspec(nt, C),                                      # per-layer prompts
            wspec(1, C), wspec(1, C),                          # ln_1
            wspec(C, C3), wspec(1, C3),                        # qkv proj (bf16 w)
            wspec(C, C), wspec(1, C),                          # out proj  (bf16 w)
            wspec(1, C), wspec(1, C),                          # ln_2
            wspec(C, C4), wspec(1, C4),                        # mlp.c_fc  (bf16 w)
            wspec(C4, C), wspec(1, C),                         # mlp.c_proj(bf16 w)
        ],
        out_specs=[
            pl.BlockSpec((1, L, C), lambda b, l: (b, 0, 0)),        # hidden (resident)
            pl.BlockSpec((1, 1, hw, C), lambda b, l: (l, b, 0, 0)),  # features
        ],
    )
    return pl.pallas_call(
        functools.partial(_transformer_kernel, heads=heads, num_tokens=nt,
                          hw=hw, eps=1e-5),
        grid_spec=grid_spec,
        out_shape=(jax.ShapeDtypeStruct((B, L, C), jnp.float32),
                   jax.ShapeDtypeStruct((layers, B, hw, C), jnp.float32)),
        compiler_params=pltpu.CompilerParams(
            dimension_semantics=("parallel", "arbitrary"),
            vmem_limit_bytes=48 * 1024 * 1024),
    )(x0, dp_all,
      params["ln1_g"], params["ln1_b"],
      params["in_proj_w"], params["in_proj_b"],
      params["out_proj_w"], params["out_proj_b"],
      params["ln2_g"], params["ln2_b"],
      params["fc_w"], params["fc_b"],
      params["cproj_w"], params["cproj_b"])


# --------------------------------- head kernel -------------------------------

def _head_kernel(x_ref, png_ref, pnb_ref, lpg_ref, lpb_ref, proj_ref, o_ref):
    """prompt_norm (eps 1e-6) -> ln_post (eps 1e-5) -> @ proj -> L2 normalize."""
    x = _layernorm(x_ref[...], png_ref[...], pnb_ref[...], 1e-6)
    x = _layernorm(x, lpg_ref[...], lpb_ref[...], 1e-5)
    e = jnp.dot(x.astype(jnp.bfloat16), proj_ref[...],
                preferred_element_type=jnp.float32)
    o_ref[...] = e * jax.lax.rsqrt(jnp.sum(e * e, axis=-1, keepdims=True))


def head_project(cls_tokens, params):
    B = cls_tokens.shape[0]
    out_dim = params["proj"].shape[1]
    return pl.pallas_call(
        _head_kernel,
        out_shape=jax.ShapeDtypeStruct((B, out_dim), jnp.float32),
    )(cls_tokens, params["prompt_norm_g"], params["prompt_norm_b"],
      params["ln_post_g"], params["ln_post_b"], params["proj"])


# ------------------------------- parameter init ------------------------------

def init_params(key, cfg):
    """Kernel-ready layouts: matmul weights (K, N) in bf16 stacked over layers,
    biases / LN affine params as (1, N) f32 — no transposes in the forward."""
    width = cfg["width"]
    layers = cfg["layers"]
    patch = cfg["patch_size"]
    spatial = cfg["input_resolution"] // patch
    out_dim = cfg["output_dim"]
    num_tokens = cfg["num_tokens"]
    prompt_dim = cfg["prompt_dim"]
    total_d_layer = cfg["total_d_layer"]
    scale = width ** -0.5

    def nrm(k, shape, s=0.02, dtype=jnp.float32):
        return (s * jax.random.normal(k, shape, dtype=jnp.float32)).astype(dtype)

    ks = iter(jax.random.split(key, 16))
    p = {}
    # conv1 weight, pre-flattened & transposed to (Cin*patch*patch, width), bf16
    p["conv1_w_kn"] = nrm(next(ks), (3 * patch * patch, width), dtype=jnp.bfloat16)
    p["class_embedding"] = scale * jax.random.normal(next(ks), (width,), jnp.float32)
    p["positional_embedding"] = scale * jax.random.normal(
        next(ks), (spatial * spatial + 1, width), jnp.float32)
    p["ln_pre_g"] = jnp.ones((1, width), jnp.float32)
    p["ln_pre_b"] = jnp.zeros((1, width), jnp.float32)
    p["ln_post_g"] = jnp.ones((1, width), jnp.float32)
    p["ln_post_b"] = jnp.zeros((1, width), jnp.float32)
    p["proj"] = nrm(next(ks), (width, out_dim), s=scale, dtype=jnp.bfloat16)

    # VPT prompt parameters
    val = math.sqrt(6.0 / float(3 * patch * patch + prompt_dim))
    p["prompt_embeddings"] = jax.random.uniform(
        next(ks), (1, num_tokens, prompt_dim), jnp.float32, -val, val)
    p["deep_prompt_embeddings"] = jax.random.uniform(
        next(ks), (total_d_layer, num_tokens, prompt_dim), jnp.float32, -val, val)
    p["prompt_proj_w"] = nrm(next(ks), (prompt_dim, prompt_dim),
                             s=math.sqrt(2.0 / prompt_dim), dtype=jnp.bfloat16)
    p["prompt_proj_b"] = jnp.zeros((1, prompt_dim), jnp.float32)
    p["prompt_norm_g"] = jnp.ones((1, prompt_dim), jnp.float32)
    p["prompt_norm_b"] = jnp.zeros((1, prompt_dim), jnp.float32)

    # transformer blocks stacked along a leading layer axis (for grid pipelining)
    p["ln1_g"] = jnp.ones((layers, 1, width), jnp.float32)
    p["ln1_b"] = jnp.zeros((layers, 1, width), jnp.float32)
    p["in_proj_w"] = nrm(next(ks), (layers, width, 3 * width), dtype=jnp.bfloat16)
    p["in_proj_b"] = jnp.zeros((layers, 1, 3 * width), jnp.float32)
    p["out_proj_w"] = nrm(next(ks), (layers, width, width), dtype=jnp.bfloat16)
    p["out_proj_b"] = jnp.zeros((layers, 1, width), jnp.float32)
    p["ln2_g"] = jnp.ones((layers, 1, width), jnp.float32)
    p["ln2_b"] = jnp.zeros((layers, 1, width), jnp.float32)
    p["fc_w"] = nrm(next(ks), (layers, width, 4 * width), dtype=jnp.bfloat16)
    p["fc_b"] = jnp.zeros((layers, 1, 4 * width), jnp.float32)
    p["cproj_w"] = nrm(next(ks), (layers, 4 * width, width), dtype=jnp.bfloat16)
    p["cproj_b"] = jnp.zeros((layers, 1, width), jnp.float32)
    return p


# -------------------------------- forward pass -------------------------------

def vpt_clip_vit_forward(x_nchw, params, cfg):
    width = cfg["width"]
    layers = cfg["layers"]
    patch = cfg["patch_size"]
    spatial = cfg["input_resolution"] // patch
    num_tokens = cfg["num_tokens"]
    out_indices = cfg["out_indices"]
    total_d_layer = cfg["total_d_layer"]
    prompt_dim = cfg["prompt_dim"]

    assert prompt_dim == width
    assert total_d_layer == layers - 1
    # TODO(synk): support total_d_layer < layers - 1 (the token-dropping branch
    # of forward_deep_prompt) and embed_v=True; not exercised by this config.

    B, Cin, Hin, Win = x_nchw.shape
    H, W = Hin // patch, Win // patch
    HW = H * W
    assert (H, W) == (spatial, spatial)
    # TODO(synk): bilinear F.interpolate resize of the positional embedding when
    # H != spatial_size; identity here (as in the PyTorch path).

    # ---- patch extraction (conv with kernel == stride -> matmul), bf16 ----
    patches = (x_nchw.reshape(B, Cin, H, patch, W, patch)
               .transpose(0, 2, 4, 1, 3, 5)
               .reshape(B, HW, Cin * patch * patch)
               .astype(jnp.bfloat16))

    pos = params["positional_embedding"]
    cls = params["class_embedding"]
    # Reference quirk: class_embedding enters both the CLS token and cls_pos.
    cls_row = (pos[0] + 2.0 * cls)[None, :]          # (1, C)
    pos_sp = pos[1:]                                 # (HW, C)

    # ---- all prompt projections in ONE matmul (dropout identity in eval) ----
    all_prompts = jnp.concatenate(
        [params["prompt_embeddings"][0],
         params["deep_prompt_embeddings"].reshape(-1, prompt_dim)], axis=0)
    proj_prompts = prompt_linear(all_prompts, params["prompt_proj_w"],
                                 params["prompt_proj_b"])      # ((1+D)*nt, C)
    shallow_prm = proj_prompts[:num_tokens]                    # (nt, C)
    deep_prm = proj_prompts[num_tokens:].reshape(total_d_layer, num_tokens, width)
    # Layer-indexed prompt table: slot 0 re-inserts the shallow prompts (no-op
    # at layer 0), slot l>0 is deep_prompt_embeddings[l-1].
    dp_all = jnp.concatenate([shallow_prm[None], deep_prm], axis=0)  # (layers, nt, C)

    # ---- stem: patch matmul + cls/pos + ln_pre + shallow prompts ----
    x0 = stem(patches, cls_row, pos_sp, shallow_prm, params, cfg, HW)  # (B, L, C)

    # ---- fused transformer: grid=(B, layers), weights pipelined over layers ----
    hidden, feats = fused_transformer(x0, dp_all, params, cfg, HW)

    features = tuple(
        feats[i].transpose(0, 2, 1).reshape(B, width, H, W) for i in out_indices)

    # ---- head: prompt_norm -> ln_post -> @ proj -> L2 normalize.  Only the CLS
    # rows are needed (visual_embedding unused when len(out_indices) > 1). ----
    global_embedding = head_project(hidden[:, 0, :], params)
    return features, global_embedding


# ------------------------------------ main -----------------------------------

if __name__ == "__main__":
    cfg = dict(
        input_resolution=32,
        patch_size=16,
        width=32,
        layers=4,
        heads=4,
        output_dim=16,
        out_indices=[1, 3],
        num_tokens=4,
        prompt_dim=32,       # must equal width (prompts are concatenated with tokens)
        total_d_layer=3,
    )

    key = jax.random.PRNGKey(0)
    k_param, k_x = jax.random.split(key)
    params = init_params(k_param, cfg)
    x = jax.random.normal(k_x, (2, 3, cfg["input_resolution"],
                                cfg["input_resolution"]), dtype=jnp.float32)

    fwd = jax.jit(functools.partial(vpt_clip_vit_forward, cfg=cfg))
    features, global_embedding = fwd(x, params)
    jax.block_until_ready(global_embedding)
    for f in features:
        jax.block_until_ready(f)

    # light sanity checks on shapes / values
    assert len(features) == len(cfg["out_indices"])
    assert features[0].shape == (2, cfg["width"], 2, 2)
    assert global_embedding.shape == (2, cfg["output_dim"])
    assert bool(jnp.all(jnp.isfinite(global_embedding)))
    assert all(bool(jnp.all(jnp.isfinite(f))) for f in features)
    print("KERNEL_OK")
</pallas_src>

<mosaic_0001>
module attributes {stable_mosaic.version = 11 : i64} {
  func.func @_linear_kernel(%arg0: memref<16x32xbf16, #tpu.memory_space<vmem>>, %arg1: memref<32x32xbf16, #tpu.memory_space<vmem>>, %arg2: memref<1x32xf32, #tpu.memory_space<vmem>>, %arg3: memref<16x32xf32, #tpu.memory_space<vmem>>) attributes {dimension_semantics = [], scalar_prefetch = 0 : i64, scratch_operands = 0 : i64, tpu.core_type = #tpu.core_type<tc>} {
    %c0 = arith.constant 0 : index
    %c0_0 = arith.constant 0 : index
    %0 = vector.load %arg0[%c0, %c0_0] : memref<16x32xbf16, #tpu.memory_space<vmem>>, vector<16x32xbf16>
    %c0_1 = arith.constant 0 : index
    %c0_2 = arith.constant 0 : index
    %1 = vector.load %arg1[%c0_1, %c0_2] : memref<32x32xbf16, #tpu.memory_space<vmem>>, vector<32x32xbf16>
    %cst = arith.constant dense<0.000000e+00> : vector<16x32xf32>
    %2 = tpu.matmul %0, %1, %cst {dimension_numbers = #tpu.dot_dimension_numbers<[1], [0], [0], [1], [0, 0, 1, 1], [], []>} : vector<16x32xbf16>, vector<32x32xbf16>, vector<16x32xf32> -> vector<16x32xf32>
    %c0_3 = arith.constant 0 : index
    %c0_4 = arith.constant 0 : index
    %3 = vector.load %arg2[%c0_3, %c0_4] : memref<1x32xf32, #tpu.memory_space<vmem>>, vector<1x32xf32>
    %4 = vector.broadcast %3 : vector<1x32xf32> to vector<16x32xf32>
    %5 = arith.addf %2, %4 : vector<16x32xf32>
    %c0_5 = arith.constant 0 : index
    %c0_6 = arith.constant 0 : index
    %6 = vector.load %arg3[%c0_5, %c0_6] : memref<16x32xf32, #tpu.memory_space<vmem>>, vector<16x32xf32>
    tpu.vector_store %arg3[%c0_5, %c0_6], %5 {strides = array<i32>} : memref<16x32xf32, #tpu.memory_space<vmem>>, vector<16x32xf32>,
    return
  }
}

module attributes {stable_mosaic.version = 11 : i64} {
  func.func @_stem_kernel(%arg0: i32, %arg1: memref<1x4x768xbf16, #tpu.memory_space<vmem>>, %arg2: memref<768x32xbf16, #tpu.memory_space<vmem>>, %arg3: memref<1x32xf32, #tpu.memory_space<vmem>>, %arg4: memref<4x32xf32, #tpu.memory_space<vmem>>, %arg5: memref<4x32xf32, #tpu.memory_space<vmem>>, %arg6: memref<1x32xf32, #tpu.memory_space<vmem>>, %arg7: memref<1x32xf32, #tpu.memory_space<vmem>>, %arg8: memref<1x9x32xf32, #tpu.memory_space<vmem>>) attributes {dimension_semantics = [#tpu.dimension_semantics<parallel>], iteration_bounds = array<i64: 2>, scalar_prefetch = 0 : i64, scratch_operands = 0 : i64, tpu.core_type = #tpu.core_type<tc>, window_params = [{transform_indices = @transform_0, window_bounds = array<i64: 1, 4, 768>}, {pipeline_mode = #tpu.pipeline_mode<synchronous>, transform_indices = @transform_1, window_bounds = array<i64: 768, 32>}, {pipeline_mode = #tpu.pipeline_mode<synchronous>, transform_indices = @transform_2, window_bounds = array<i64: 1, 32>}, {pipeline_mode = #tpu.pipeline_mode<synchronous>, transform_indices = @transform_3, window_bounds = array<i64: 4, 32>}, {pipeline_mode = #tpu.pipeline_mode<synchronous>, transform_indices = @transform_4, window_bounds = array<i64: 4, 32>}, {pipeline_mode = #tpu.pipeline_mode<synchronous>, transform_indices = @transform_5, window_bounds = array<i64: 1, 32>}, {pipeline_mode = #tpu.pipeline_mode<synchronous>, transform_indices = @transform_6, window_bounds = array<i64: 1, 32>}, {transform_indices = @transform_7, window_bounds = array<i64: 1, 9, 32>}]} {
    %c0 = arith.constant 0 : index
    %c0_0 = arith.constant 0 : index
    %c0_1 = arith.constant 0 : index
    %0 = vector.load %arg1[%c0, %c0_0, %c0_1] : memref<1x4x768xbf16, #tpu.memory_space<vmem>>, vector<1x4x768xbf16>
    %1 = vector.shape_cast %0 : vector<1x4x768xbf16> to vector<4x768xbf16>
    %c0_2 = arith.constant 0 : index
    %c0_3 = arith.constant 0 : index
    %2 = vector.load %arg2[%c0_2, %c0_3] : memref<768x32xbf16, #tpu.memory_space<vmem>>, vector<768x32xbf16>
    %cst = arith.constant dense<0.000000e+00> : vector<4x32xf32>
    %3 = tpu.matmul %1, %2, %cst {dimension_numbers = #tpu.dot_dimension_numbers<[1], [0], [0], [1], [0, 0, 1, 1], [], []>} : vector<4x768xbf16>, vector<768x32xbf16>, vector<4x32xf32> -> vector<4x32xf32>
    %c0_4 = arith.constant 0 : index
    %c0_5 = arith.constant 0 : index
    %4 = vector.load %arg3[%c0_4, %c0_5] : memref<1x32xf32, #tpu.memory_space<vmem>>, vector<1x32xf32>
    %c0_6 = arith.constant 0 : index
    %c0_7 = arith.constant 0 : index
    %5 = vector.load %arg4[%c0_6, %c0_7] : memref<4x32xf32, #tpu.memory_space<vmem>>, vector<4x32xf32>
    %6 = arith.addf %3, %5 : vector<4x32xf32>
    %7 = tpu.concatenate %4, %6 in 0 : vector<1x32xf32>, vector<4x32xf32> -> vector<5x32xf32>
    %c0_8 = arith.constant 0 : index
    %c0_9 = arith.constant 0 : index
    %8 = vector.load %arg6[%c0_8, %c0_9] : memref<1x32xf32, #tpu.memory_space<vmem>>, vector<1x32xf32>
    %c0_10 = arith.constant 0 : index
    %c0_11 = arith.constant 0 : index
    %9 = vector.load %arg7[%c0_10, %c0_11] : memref<1x32xf32, #tpu.memory_space<vmem>>, vector<1x32xf32>
    %cst_12 = arith.constant dense<0.000000e+00> : vector<5xf32>
    %10 = vector.multi_reduction <add>, %7, %cst_12 [1] : vector<5x32xf32> to vector<5xf32>
    %11 = vector.shape_cast %10 : vector<5xf32> to vector<5x1xf32>
    %cst_13 = arith.constant 3.200000e+01 : f32
    %12 = vector.broadcast %cst_13 : f32 to vector<5x1xf32>
    %13 = arith.divf %11, %12 : vector<5x1xf32>
    %14 = vector.broadcast %13 : vector<5x1xf32> to vector<5x32xf32>
    %15 = arith.subf %7, %14 : vector<5x32xf32>
    %16 = arith.mulf %15, %15 : vector<5x32xf32>
    %cst_14 = arith.constant dense<0.000000e+00> : vector<5xf32>
    %17 = vector.multi_reduction <add>, %16, %cst_14 [1] : vector<5x32xf32> to vector<5xf32>
    %18 = vector.shape_cast %17 : vector<5xf32> to vector<5x1xf32>
    %cst_15 = arith.constant 3.200000e+01 : f32
    %19 = vector.broadcast %cst_15 : f32 to vector<5x1xf32>
    %20 = arith.divf %18, %19 : vector<5x1xf32>
    %cst_16 = arith.constant 9.99999974E-6 : f32
    %21 = vector.broadcast %cst_16 : f32 to vector<5x1xf32>
    %22 = arith.addf %20, %21 : vector<5x1xf32>
    %23 = math.rsqrt %22 : vector<5x1xf32>
    %24 = vector.broadcast %23 : vector<5x1xf32> to vector<5x32xf32>
    %25 = arith.mulf %15, %24 : vector<5x32xf32>
    %26 = vector.broadcast %8 : vector<1x32xf32> to vector<5x32xf32>
    %27 = arith.mulf %25, %26 : vector<5x32xf32>
    %28 = vector.broadcast %9 : vector<1x32xf32> to vector<5x32xf32>
    %29 = arith.addf %27, %28 : vector<5x32xf32>
    %30 = vector.extract_strided_slice %29 {offsets = [0, 0], sizes = [1, 32], strides = [1, 1]} : vector<5x32xf32> to vector<1x32xf32>
    %c0_17 = arith.constant 0 : index
    %c0_18 = arith.constant 0 : index
    %31 = vector.load %arg5[%c0_17, %c0_18] : memref<4x32xf32, #tpu.memory_space<vmem>>, vector<4x32xf32>
    %32 = vector.extract_strided_slice %29 {offsets = [1, 0], sizes = [4, 32], strides = [1, 1]} : vector<5x32xf32> to vector<4x32xf32>
    %33 = tpu.concatenate %30, %31, %32 in 0 : vector<1x32xf32>, vector<4x32xf32>, vector<4x32xf32> -> vector<9x32xf32>
    %c0_19 = arith.constant 0 : index
    %c0_20 = arith.constant 0 : index
    %c0_21 = arith.constant 0 : index
    %34 = vector.load %arg8[%c0_19, %c0_20, %c0_21] : memref<1x9x32xf32, #tpu.memory_space<vmem>>, vector<1x9x32xf32>
    %35 = vector.shape_cast %34 : vector<1x9x32xf32> to vector<9x32xf32>
    %36 = vector.shape_cast %33 : vector<9x32xf32> to vector<1x9x32xf32>
    tpu.vector_store %arg8[%c0_19, %c0_20, %c0_21], %36 {strides = array<i32>} : memref<1x9x32xf32, #tpu.memory_space<vmem>>, vector<1x9x32xf32>,
    return
  }
  func.func @transform_0(%arg0: i32) -> (i32, i32, i32) {
    %c0_i32 = arith.constant 0 : i32
    %c0_i32_0 = arith.constant 0 : i32
    %c0_i32_1 = arith.constant 0 : i32
    return %arg0, %c0_i32, %c0_i32_0 : i32, i32, i32
  }
  func.func @transform_1(%arg0: i32) -> (i32, i32) {
    %c0_i32 = arith.constant 0 : i32
    %c0_i32_0 = arith.constant 0 : i32
    %c0_i32_1 = arith.constant 0 : i32
    return %c0_i32, %c0_i32_0 : i32, i32
  }
  func.func @transform_2(%arg0: i32) -> (i32, i32) {
    %c0_i32 = arith.constant 0 : i32
    %c0_i32_0 = arith.constant 0 : i32
    %c0_i32_1 = arith.constant 0 : i32
    return %c0_i32, %c0_i32_0 : i32, i32
  }
  func.func @transform_3(%arg0: i32) -> (i32, i32) {
    %c0_i32 = arith.constant 0 : i32
    %c0_i32_0 = arith.constant 0 : i32
    %c0_i32_1 = arith.constant 0 : i32
    return %c0_i32, %c0_i32_0 : i32, i32
  }
  func.func @transform_4(%arg0: i32) -> (i32, i32) {
    %c0_i32 = arith.constant 0 : i32
    %c0_i32_0 = arith.constant 0 : i32
    %c0_i32_1 = arith.constant 0 : i32
    return %c0_i32, %c0_i32_0 : i32, i32
  }
  func.func @transform_5(%arg0: i32) -> (i32, i32) {
    %c0_i32 = arith.constant 0 : i32
    %c0_i32_0 = arith.constant 0 : i32
    %c0_i32_1 = arith.constant 0 : i32
    return %c0_i32, %c0_i32_0 : i32, i32
  }
  func.func @transform_6(%arg0: i32) -> (i32, i32) {
    %c0_i32 = arith.constant 0 : i32
    %c0_i32_0 = arith.constant 0 : i32
    %c0_i32_1 = arith.constant 0 : i32
    return %c0_i32, %c0_i32_0 : i32, i32
  }
  func.func @transform_7(%arg0: i32) -> (i32, i32, i32) {
    %c0_i32 = arith.constant 0 : i32
    %c0_i32_0 = arith.constant 0 : i32
    %c0_i32_1 = arith.constant 0 : i32
    return %arg0, %c0_i32, %c0_i32_0 : i32, i32, i32
  }
}

module attributes {stable_mosaic.version = 11 : i64} {
  func.func @_transformer_kernel(%arg0: i32, %arg1: i32, %arg2: memref<1x9x32xf32, #tpu.memory_space<vmem>>, %arg3: memref<1x4x32xf32, #tpu.memory_space<vmem>>, %arg4: memref<1x1x32xf32, #tpu.memory_space<vmem>>, %arg5: memref<1x1x32xf32, #tpu.memory_space<vmem>>, %arg6: memref<1x32x96xbf16, #tpu.memory_space<vmem>>, %arg7: memref<1x1x96xf32, #tpu.memory_space<vmem>>, %arg8: memref<1x32x32xbf16, #tpu.memory_space<vmem>>, %arg9: memref<1x1x32xf32, #tpu.memory_space<vmem>>, %arg10: memref<1x1x32xf32, #tpu.memory_space<vmem>>, %arg11: memref<1x1x32xf32, #tpu.memory_space<vmem>>, %arg12: memref<1x32x128xbf16, #tpu.memory_space<vmem>>, %arg13: memref<1x1x128xf32, #tpu.memory_space<vmem>>, %arg14: memref<1x128x32xbf16, #tpu.memory_space<vmem>>, %arg15: memref<1x1x32xf32, #tpu.memory_space<vmem>>, %arg16: memref<1x9x32xf32, #tpu.memory_space<vmem>>, %arg17: memref<1x1x4x32xf32, #tpu.memory_space<vmem>>) attributes {dimension_semantics = [#tpu.dimension_semantics<parallel>, #tpu.dimension_semantics<arbitrary>], iteration_bounds = array<i64: 2, 4>, scalar_prefetch = 0 : i64, scratch_operands = 0 : i64, tpu.core_type = #tpu.core_type<tc>, window_params = [{transform_indices = @transform_0, window_bounds = array<i64: 1, 9, 32>}, {transform_indices = @transform_1, window_bounds = array<i64: 1, 4, 32>}, {transform_indices = @transform_2, window_bounds = array<i64: 1, 1, 32>}, {transform_indices = @transform_3, window_bounds = array<i64: 1, 1, 32>}, {transform_indices = @transform_4, window_bounds = array<i64: 1, 32, 96>}, {transform_indices = @transform_5, window_bounds = array<i64: 1, 1, 96>}, {transform_indices = @transform_6, window_bounds = array<i64: 1, 32, 32>}, {transform_indices = @transform_7, window_bounds = array<i64: 1, 1, 32>}, {transform_indices = @transform_8, window_bounds = array<i64: 1, 1, 32>}, {transform_indices = @transform_9, window_bounds = array<i64: 1, 1, 32>}, {transform_indices = @transform_10, window_bounds = array<i64: 1, 32, 128>}, {transform_indices = @transform_11, window_bounds = array<i64: 1, 1, 128>}, {transform_indices = @transform_12, window_bounds = array<i64: 1, 128, 32>}, {transform_indices = @transform_13, window_bounds = array<i64: 1, 1, 32>}, {transform_indices = @transform_14, window_bounds = array<i64: 1, 9, 32>}, {transform_indices = @transform_15, window_bounds = array<i64: 1, 1, 4, 32>}]} {
    %c0_i32 = arith.constant 0 : i32
    %0 = arith.cmpi eq, %arg1, %c0_i32 : i32
    %1 = arith.extui %0 : i1 to i32
    %c0_i32_0 = arith.constant 0 : i32
    %2 = arith.cmpi ne, %1, %c0_i32_0 : i32
    scf.if %2 {
      %c0_84 = arith.constant 0 : index
      %c0_85 = arith.constant 0 : index
      %c0_86 = arith.constant 0 : index
      %192 = vector.load %arg2[%c0_84, %c0_85, %c0_86] : memref<1x9x32xf32, #tpu.memory_space<vmem>>, vector<1x9x32xf32>
      %c0_87 = arith.constant 0 : index
      %c0_88 = arith.constant 0 : index
      %c0_89 = arith.constant 0 : index
      %193 = vector.load %arg16[%c0_87, %c0_88, %c0_89] : memref<1x9x32xf32, #tpu.memory_space<vmem>>, vector<1x9x32xf32>
      tpu.vector_store %arg16[%c0_87, %c0_88, %c0_89], %192 {strides = array<i32>} : memref<1x9x32xf32, #tpu.memory_space<vmem>>, vector<1x9x32xf32>,
    } else {
    }
    %c0 = arith.constant 0 : index
    %c0_1 = arith.constant 0 : index
    %c0_2 = arith.constant 0 : index
    %3 = vector.load %arg16[%c0, %c0_1, %c0_2] : memref<1x9x32xf32, #tpu.memory_space<vmem>>, vector<1x9x32xf32>
    %4 = vector.shape_cast %3 : vector<1x9x32xf32> to vector<9x32xf32>
    %5 = vector.extract_strided_slice %4 {offsets = [0, 0], sizes = [1, 32], strides = [1, 1]} : vector<9x32xf32> to vector<1x32xf32>
    %c0_3 = arith.constant 0 : index
    %c0_4 = arith.constant 0 : index
    %c0_5 = arith.constant 0 : index
    %6 = vector.load %arg3[%c0_3, %c0_4, %c0_5] : memref<1x4x32xf32, #tpu.memory_space<vmem>>, vector<1x4x32xf32>
    %7 = vector.shape_cast %6 : vector<1x4x32xf32> to vector<4x32xf32>
    %8 = vector.extract_strided_slice %4 {offsets = [5, 0], sizes = [4, 32], strides = [1, 1]} : vector<9x32xf32> to vector<4x32xf32>
    %9 = tpu.concatenate %5, %7, %8 in 0 : vector<1x32xf32>, vector<4x32xf32>, vector<4x32xf32> -> vector<9x32xf32>
    %c0_6 = arith.constant 0 : index
    %c0_7 = arith.constant 0 : index
    %c0_8 = arith.constant 0 : index
    %10 = vector.load %arg4[%c0_6, %c0_7, %c0_8] : memref<1x1x32xf32, #tpu.memory_space<vmem>>, vector<1x1x32xf32>
    %11 = vector.shape_cast %10 : vector<1x1x32xf32> to vector<1x32xf32>
    %c0_9 = arith.constant 0 : index
    %c0_10 = arith.constant 0 : index
    %c0_11 = arith.constant 0 : index
    %12 = vector.load %arg5[%c0_9, %c0_10, %c0_11] : memref<1x1x32xf32, #tpu.memory_space<vmem>>, vector<1x1x32xf32>
    %13 = vector.shape_cast %12 : vector<1x1x32xf32> to vector<1x32xf32>
    %cst = arith.constant dense<0.000000e+00> : vector<9xf32>
    %14 = vector.multi_reduction <add>, %9, %cst [1] : vector<9x32xf32> to vector<9xf32>
    %15 = vector.shape_cast %14 : vector<9xf32> to vector<9x1xf32>
    %cst_12 = arith.constant 3.200000e+01 : f32
    %16 = vector.broadcast %cst_12 : f32 to vector<9x1xf32>
    %17 = arith.divf %15, %16 : vector<9x1xf32>
    %18 = vector.broadcast %17 : vector<9x1xf32> to vector<9x32xf32>
    %19 = arith.subf %9, %18 : vector<9x32xf32>
    %20 = arith.mulf %19, %19 : vector<9x32xf32>
    %cst_13 = arith.constant dense<0.000000e+00> : vector<9xf32>
    %21 = vector.multi_reduction <add>, %20, %cst_13 [1] : vector<9x32xf32> to vector<9xf32>
    %22 = vector.shape_cast %21 : vector<9xf32> to vector<9x1xf32>
    %cst_14 = arith.constant 3.200000e+01 : f32
    %23 = vector.broadcast %cst_14 : f32 to vector<9x1xf32>
    %24 = arith.divf %22, %23 : vector<9x1xf32>
    %cst_15 = arith.constant 9.99999974E-6 : f32
    %25 = vector.broadcast %cst_15 : f32 to vector<9x1xf32>
    %26 = arith.addf %24, %25 : vector<9x1xf32>
    %27 = math.rsqrt %26 : vector<9x1xf32>
    %28 = vector.broadcast %27 : vector<9x1xf32> to vector<9x32xf32>
    %29 = arith.mulf %19, %28 : vector<9x32xf32>
    %30 = vector.broadcast %11 : vector<1x32xf32> to vector<9x32xf32>
    %31 = arith.mulf %29, %30 : vector<9x32xf32>
    %32 = vector.broadcast %13 : vector<1x32xf32> to vector<9x32xf32>
    %33 = arith.addf %31, %32 : vector<9x32xf32>
    %34 = arith.truncf %33 : vector<9x32xf32> to vector<9x32xbf16>
    %c0_16 = arith.constant 0 : index
    %c0_17 = arith.constant 0 : index
    %c0_18 = arith.constant 0 : index
    %35 = vector.load %arg6[%c0_16, %c0_17, %c0_18] : memref<1x32x96xbf16, #tpu.memory_space<vmem>>, vector<1x32x96xbf16>
    %36 = vector.shape_cast %35 : vector<1x32x96xbf16> to vector<32x96xbf16>
    %cst_19 = arith.constant dense<0.000000e+00> : vector<9x96xf32>
    %37 = tpu.matmul %34, %36, %cst_19 {dimension_numbers = #tpu.dot_dimension_numbers<[1], [0], [0], [1], [0, 0, 1, 1], [], []>} : vector<9x32xbf16>, vector<32x96xbf16>, vector<9x96xf32> -> vector<9x96xf32>
    %c0_20 = arith.constant 0 : index
    %c0_21 = arith.constant 0 : index
    %c0_22 = arith.constant 0 : index
    %38 = vector.load %arg7[%c0_20, %c0_21, %c0_22] : memref<1x1x96xf32, #tpu.memory_space<vmem>>, vector<1x1x96xf32>
    %39 = vector.shape_cast %38 : vector<1x1x96xf32> to vector<1x96xf32>
    %40 = vector.broadcast %39 : vector<1x96xf32> to vector<9x96xf32>
    %41 = arith.addf %37, %40 : vector<9x96xf32>
    %42 = vector.extract_strided_slice %41 {offsets = [0, 0], sizes = [9, 8], strides = [1, 1]} : vector<9x96xf32> to vector<9x8xf32>
    %43 = arith.truncf %42 : vector<9x8xf32> to vector<9x8xbf16>
    %44 = vector.extract_strided_slice %41 {offsets = [0, 32], sizes = [9, 8], strides = [1, 1]} : vector<9x96xf32> to vector<9x8xf32>
    %45 = arith.truncf %44 : vector<9x8xf32> to vector<9x8xbf16>
    %46 = vector.extract_strided_slice %41 {offsets = [0, 64], sizes = [9, 8], strides = [1, 1]} : vector<9x96xf32> to vector<9x8xf32>
    %47 = arith.truncf %46 : vector<9x8xf32> to vector<9x8xbf16>
    %cst_23 = arith.constant dense<0.000000e+00> : vector<9x9xf32>
    %48 = tpu.matmul %43, %45, %cst_23 {dimension_numbers = #tpu.dot_dimension_numbers<[1], [1], [0], [0], [0, 0, 1, 0], [], []>} : vector<9x8xbf16>, vector<9x8xbf16>, vector<9x9xf32> -> vector<9x9xf32>
    %cst_24 = arith.constant 0.353553385 : f32
    %49 = vector.broadcast %cst_24 : f32 to vector<9x9xf32>
    %50 = arith.mulf %48, %49 : vector<9x9xf32>
    %cst_25 = arith.constant dense<0xFF800000> : vector<9xf32>
    %51 = vector.multi_reduction <maximumf>, %50, %cst_25 [1] : vector<9x9xf32> to vector<9xf32>
    %52 = vector.shape_cast %51 : vector<9xf32> to vector<9x1xf32>
    %53 = vector.broadcast %52 : vector<9x1xf32> to vector<9x9xf32>
    %54 = arith.subf %50, %53 : vector<9x9xf32>
    %55 = math.exp %54 : vector<9x9xf32>
    %cst_26 = arith.constant dense<0.000000e+00> : vector<9xf32>
    %56 = vector.multi_reduction <add>, %55, %cst_26 [1] : vector<9x9xf32> to vector<9xf32>
    %57 = vector.shape_cast %56 : vector<9xf32> to vector<9x1xf32>
    %58 = tpu.reciprocal %57 {approx = true} : vector<9x1xf32> -> vector<9x1xf32>
    %59 = vector.broadcast %58 : vector<9x1xf32> to vector<9x9xf32>
    %60 = arith.mulf %55, %59 : vector<9x9xf32>
    %61 = arith.truncf %60 : vector<9x9xf32> to vector<9x9xbf16>
    %cst_27 = arith.constant dense<0.000000e+00> : vector<9x8xf32>
    %62 = tpu.matmul %61, %47, %cst_27 {dimension_numbers = #tpu.dot_dimension_numbers<[1], [0], [0], [1], [0, 0, 1, 1], [], []>} : vector<9x9xbf16>, vector<9x8xbf16>, vector<9x8xf32> -> vector<9x8xf32>
    %63 = vector.extract_strided_slice %41 {offsets = [0, 8], sizes = [9, 8], strides = [1, 1]} : vector<9x96xf32> to vector<9x8xf32>
    %64 = arith.truncf %63 : vector<9x8xf32> to vector<9x8xbf16>
    %65 = vector.extract_strided_slice %41 {offsets = [0, 40], sizes = [9, 8], strides = [1, 1]} : vector<9x96xf32> to vector<9x8xf32>
    %66 = arith.truncf %65 : vector<9x8xf32> to vector<9x8xbf16>
    %67 = vector.extract_strided_slice %41 {offsets = [0, 72], sizes = [9, 8], strides = [1, 1]} : vector<9x96xf32> to vector<9x8xf32>
    %68 = arith.truncf %67 : vector<9x8xf32> to vector<9x8xbf16>
    %cst_28 = arith.constant dense<0.000000e+00> : vector<9x9xf32>
    %69 = tpu.matmul %64, %66, %cst_28 {dimension_numbers = #tpu.dot_dimension_numbers<[1], [1], [0], [0], [0, 0, 1, 0], [], []>} : vector<9x8xbf16>, vector<9x8xbf16>, vector<9x9xf32> -> vector<9x9xf32>
    %cst_29 = arith.constant 0.353553385 : f32
    %70 = vector.broadcast %cst_29 : f32 to vector<9x9xf32>
    %71 = arith.mulf %69, %70 : vector<9x9xf32>
    %cst_30 = arith.constant dense<0xFF800000> : vector<9xf32>
    %72 = vector.multi_reduction <maximumf>, %71, %cst_30 [1] : vector<9x9xf32> to vector<9xf32>
    %73 = vector.shape_cast %72 : vector<9xf32> to vector<9x1xf32>
    %74 = vector.broadcast %73 : vector<9x1xf32> to vector<9x9xf32>
    %75 = arith.subf %71, %74 : vector<9x9xf32>
    %76 = math.exp %75 : vector<9x9xf32>
    %cst_31 = arith.constant dense<0.000000e+00> : vector<9xf32>
    %77 = vector.multi_reduction <add>, %76, %cst_31 [1] : vector<9x9xf32> to vector<9xf32>
    %78 = vector.shape_cast %77 : vector<9xf32> to vector<9x1xf32>
    %79 = tpu.reciprocal %78 {approx = true} : vector<9x1xf32> -> vector<9x1xf32>
    %80 = vector.broadcast %79 : vector<9x1xf32> to vector<9x9xf32>
    %81 = arith.mulf %76, %80 : vector<9x9xf32>
    %82 = arith.truncf %81 : vector<9x9xf32> to vector<9x9xbf16>
    %cst_32 = arith.constant dense<0.000000e+00> : vector<9x8xf32>
    %83 = tpu.matmul %82, %68, %cst_32 {dimension_numbers = #tpu.dot_dimension_numbers<[1], [0], [0], [1], [0, 0, 1, 1], [], []>} : vector<9x9xbf16>, vector<9x8xbf16>, vector<9x8xf32> -> vector<9x8xf32>
    %84 = vector.extract_strided_slice %41 {offsets = [0, 16], sizes = [9, 8], strides = [1, 1]} : vector<9x96xf32> to vector<9x8xf32>
    %85 = arith.truncf %84 : vector<9x8xf32> to vector<9x8xbf16>
    %86 = vector.extract_strided_slice %41 {offsets = [0, 48], sizes = [9, 8], strides = [1, 1]} : vector<9x96xf32> to vector<9x8xf32>
    %87 = arith.truncf %86 : vector<9x8xf32> to vector<9x8xbf16>
    %88 = vector.extract_strided_slice %41 {offsets = [0, 80], sizes = [9, 8], strides = [1, 1]} : vector<9x96xf32> to vector<9x8xf32>
    %89 = arith.truncf %88 : vector<9x8xf32> to vector<9x8xbf16>
    %cst_33 = arith.constant dense<0.000000e+00> : vector<9x9xf32>
    %90 = tpu.matmul %85, %87, %cst_33 {dimension_numbers = #tpu.dot_dimension_numbers<[1], [1], [0], [0], [0, 0, 1, 0], [], []>} : vector<9x8xbf16>, vector<9x8xbf16>, vector<9x9xf32> -> vector<9x9xf32>
    %cst_34 = arith.constant 0.353553385 : f32
    %91 = vector.broadcast %cst_34 : f32 to vector<9x9xf32>
    %92 = arith.mulf %90, %91 : vector<9x9xf32>
    %cst_35 = arith.constant dense<0xFF800000> : vector<9xf32>
    %93 = vector.multi_reduction <maximumf>, %92, %cst_35 [1] : vector<9x9xf32> to vector<9xf32>
    %94 = vector.shape_cast %93 : vector<9xf32> to vector<9x1xf32>
    %95 = vector.broadcast %94 : vector<9x1xf32> to vector<9x9xf32>
    %96 = arith.subf %92, %95 : vector<9x9xf32>
    %97 = math.exp %96 : vector<9x9xf32>
    %cst_36 = arith.constant dense<0.000000e+00> : vector<9xf32>
    %98 = vector.multi_reduction <add>, %97, %cst_36 [1] : vector<9x9xf32> to vector<9xf32>
    %99 = vector.shape_cast %98 : vector<9xf32> to vector<9x1xf32>
    %100 = tpu.reciprocal %99 {approx = true} : vector<9x1xf32> -> vector<9x1xf32>
    %101 = vector.broadcast %100 : vector<9x1xf32> to vector<9x9xf32>
    %102 = arith.mulf %97, %101 : vector<9x9xf32>
    %103 = arith.truncf %102 : vector<9x9xf32> to vector<9x9xbf16>
    %cst_37 = arith.constant dense<0.000000e+00> : vector<9x8xf32>
    %104 = tpu.matmul %103, %89, %cst_37 {dimension_numbers = #tpu.dot_dimension_numbers<[1], [0], [0], [1], [0, 0, 1, 1], [], []>} : vector<9x9xbf16>, vector<9x8xbf16>, vector<9x8xf32> -> vector<9x8xf32>
    %105 = vector.extract_strided_slice %41 {offsets = [0, 24], sizes = [9, 8], strides = [1, 1]} : vector<9x96xf32> to vector<9x8xf32>
    %106 = arith.truncf %105 : vector<9x8xf32> to vector<9x8xbf16>
    %107 = vector.extract_strided_slice %41 {offsets = [0, 56], sizes = [9, 8], strides = [1, 1]} : vector<9x96xf32> to vector<9x8xf32>
    %108 = arith.truncf %107 : vector<9x8xf32> to vector<9x8xbf16>
    %109 = vector.extract_strided_slice %41 {offsets = [0, 88], sizes = [9, 8], strides = [1, 1]} : vector<9x96xf32> to vector<9x8xf32>
    %110 = arith.truncf %109 : vector<9x8xf32> to vector<9x8xbf16>
    %cst_38 = arith.constant dense<0.000000e+00> : vector<9x9xf32>
    %111 = tpu.matmul %106, %108, %cst_38 {dimension_numbers = #tpu.dot_dimension_numbers<[1], [1], [0], [0], [0, 0, 1, 0], [], []>} : vector<9x8xbf16>, vector<9x8xbf16>, vector<9x9xf32> -> vector<9x9xf32>
    %cst_39 = arith.constant 0.353553385 : f32
    %112 = vector.broadcast %cst_39 : f32 to vector<9x9xf32>
    %113 = arith.mulf %111, %112 : vector<9x9xf32>
    %cst_40 = arith.constant dense<0xFF800000> : vector<9xf32>
    %114 = vector.multi_reduction <maximumf>, %113, %cst_40 [1] : vector<9x9xf32> to vector<9xf32>
    %115 = vector.shape_cast %114 : vector<9xf32> to vector<9x1xf32>
    %116 = vector.broadcast %115 : vector<9x1xf32> to vector<9x9xf32>
    %117 = arith.subf %113, %116 : vector<9x9xf32>
    %118 = math.exp %117 : vector<9x9xf32>
    %cst_41 = arith.constant dense<0.000000e+00> : vector<9xf32>
    %119 = vector.multi_reduction <add>, %118, %cst_41 [1] : vector<9x9xf32> to vector<9xf32>
    %120 = vector.shape_cast %119 : vector<9xf32> to vector<9x1xf32>
    %121 = tpu.reciprocal %120 {approx = true} : vector<9x1xf32> -> vector<9x1xf32>
    %122 = vector.broadcast %121 : vector<9x1xf32> to vector<9x9xf32>
    %123 = arith.mulf %118, %122 : vector<9x9xf32>
    %124 = arith.truncf %123 : vector<9x9xf32> to vector<9x9xbf16>
    %cst_42 = arith.constant dense<0.000000e+00> : vector<9x8xf32>
    %125 = tpu.matmul %124, %110, %cst_42 {dimension_numbers = #tpu.dot_dimension_numbers<[1], [0], [0], [1], [0, 0, 1, 1], [], []>} : vector<9x9xbf16>, vector<9x8xbf16>, vector<9x8xf32> -> vector<9x8xf32>
    %126 = tpu.concatenate %62, %83, %104, %125 in 1 : vector<9x8xf32>, vector<9x8xf32>, vector<9x8xf32>, vector<9x8xf32> -> vector<9x32xf32>
    %127 = arith.truncf %126 : vector<9x32xf32> to vector<9x32xbf16>
    %c0_43 = arith.constant 0 : index
    %c0_44 = arith.constant 0 : index
    %c0_45 = arith.constant 0 : index
    %128 = vector.load %arg8[%c0_43, %c0_44, %c0_45] : memref<1x32x32xbf16, #tpu.memory_space<vmem>>, vector<1x32x32xbf16>
    %129 = vector.shape_cast %128 : vector<1x32x32xbf16> to vector<32x32xbf16>
    %cst_46 = arith.constant dense<0.000000e+00> : vector<9x32xf32>
    %130 = tpu.matmul %127, %129, %cst_46 {dimension_numbers = #tpu.dot_dimension_numbers<[1], [0], [0], [1], [0, 0, 1, 1], [], []>} : vector<9x32xbf16>, vector<32x32xbf16>, vector<9x32xf32> -> vector<9x32xf32>
    %c0_47 = arith.constant 0 : index
    %c0_48 = arith.constant 0 : index
    %c0_49 = arith.constant 0 : index
    %131 = vector.load %arg9[%c0_47, %c0_48, %c0_49] : memref<1x1x32xf32, #tpu.memory_space<vmem>>, vector<1x1x32xf32>
    %132 = vector.shape_cast %131 : vector<1x1x32xf32> to vector<1x32xf32>
    %133 = vector.broadcast %132 : vector<1x32xf32> to vector<9x32xf32>
    %134 = arith.addf %130, %133 : vector<9x32xf32>
    %135 = arith.addf %9, %134 : vector<9x32xf32>
    %c0_50 = arith.constant 0 : index
    %c0_51 = arith.constant 0 : index
    %c0_52 = arith.constant 0 : index
    %136 = vector.load %arg10[%c0_50, %c0_51, %c0_52] : memref<1x1x32xf32, #tpu.memory_space<vmem>>, vector<1x1x32xf32>
    %137 = vector.shape_cast %136 : vector<1x1x32xf32> to vector<1x32xf32>
    %c0_53 = arith.constant 0 : index
    %c0_54 = arith.constant 0 : index
    %c0_55 = arith.constant 0 : index
    %138 = vector.load %arg11[%c0_53, %c0_54, %c0_55] : memref<1x1x32xf32, #tpu.memory_space<vmem>>, vector<1x1x32xf32>
    %139 = vector.shape_cast %138 : vector<1x1x32xf32> to vector<1x32xf32>
    %cst_56 = arith.constant dense<0.000000e+00> : vector<9xf32>
    %140 = vector.multi_reduction <add>, %135, %cst_56 [1] : vector<9x32xf32> to vector<9xf32>
    %141 = vector.shape_cast %140 : vector<9xf32> to vector<9x1xf32>
    %cst_57 = arith.constant 3.200000e+01 : f32
    %142 = vector.broadcast %cst_57 : f32 to vector<9x1xf32>
    %143 = arith.divf %141, %142 : vector<9x1xf32>
    %144 = vector.broadcast %143 : vector<9x1xf32> to vector<9x32xf32>
    %145 = arith.subf %135, %144 : vector<9x32xf32>
    %146 = arith.mulf %145, %145 : vector<9x32xf32>
    %cst_58 = arith.constant dense<0.000000e+00> : vector<9xf32>
    %147 = vector.multi_reduction <add>, %146, %cst_58 [1] : vector<9x32xf32> to vector<9xf32>
    %148 = vector.shape_cast %147 : vector<9xf32> to vector<9x1xf32>
    %cst_59 = arith.constant 3.200000e+01 : f32
    %149 = vector.broadcast %cst_59 : f32 to vector<9x1xf32>
    %150 = arith.divf %148, %149 : vector<9x1xf32>
    %cst_60 = arith.constant 9.99999974E-6 : f32
    %151 = vector.broadcast %cst_60 : f32 to vector<9x1xf32>
    %152 = arith.addf %150, %151 : vector<9x1xf32>
    %153 = math.rsqrt %152 : vector<9x1xf32>
    %154 = vector.broadcast %153 : vector<9x1xf32> to vector<9x32xf32>
    %155 = arith.mulf %145, %154 : vector<9x32xf32>
    %156 = vector.broadcast %137 : vector<1x32xf32> to vector<9x32xf32>
    %157 = arith.mulf %155, %156 : vector<9x32xf32>
    %158 = vector.broadcast %139 : vector<1x32xf32> to vector<9x32xf32>
    %159 = arith.addf %157, %158 : vector<9x32xf32>
    %160 = arith.truncf %159 : vector<9x32xf32> to vector<9x32xbf16>
    %c0_61 = arith.constant 0 : index
    %c0_62 = arith.constant 0 : index
    %c0_63 = arith.constant 0 : index
    %161 = vector.load %arg12[%c0_61, %c0_62, %c0_63] : memref<1x32x128xbf16, #tpu.memory_space<vmem>>, vector<1x32x128xbf16>
    %162 = vector.shape_cast %161 : vector<1x32x128xbf16> to vector<32x128xbf16>
    %cst_64 = arith.constant dense<0.000000e+00> : vector<9x128xf32>
    %163 = tpu.matmul %160, %162, %cst_64 {dimension_numbers = #tpu.dot_dimension_numbers<[1], [0], [0], [1], [0, 0, 1, 1], [], []>} : vector<9x32xbf16>, vector<32x128xbf16>, vector<9x128xf32> -> vector<9x128xf32>
    %c0_65 = arith.constant 0 : index
    %c0_66 = arith.constant 0 : index
    %c0_67 = arith.constant 0 : index
    %164 = vector.load %arg13[%c0_65, %c0_66, %c0_67] : memref<1x1x128xf32, #tpu.memory_space<vmem>>, vector<1x1x128xf32>
    %165 = vector.shape_cast %164 : vector<1x1x128xf32> to vector<1x128xf32>
    %166 = vector.broadcast %165 : vector<1x128xf32> to vector<9x128xf32>
    %167 = arith.addf %163, %166 : vector<9x128xf32>
    %cst_68 = arith.constant 1.702000e+00 : f32
    %168 = vector.broadcast %cst_68 : f32 to vector<9x128xf32>
    %169 = arith.mulf %168, %167 : vector<9x128xf32>
    %170 = arith.negf %169 : vector<9x128xf32>
    %171 = math.exp %170 : vector<9x128xf32>
    %cst_69 = arith.constant 1.000000e+00 : f32
    %172 = vector.broadcast %cst_69 : f32 to vector<9x128xf32>
    %173 = arith.addf %172, %171 : vector<9x128xf32>
    %174 = arith.divf %172, %173 : vector<9x128xf32>
    %175 = arith.mulf %167, %174 : vector<9x128xf32>
    %176 = arith.truncf %175 : vector<9x128xf32> to vector<9x128xbf16>
    %c0_70 = arith.constant 0 : index
    %c0_71 = arith.constant 0 : index
    %c0_72 = arith.constant 0 : index
    %177 = vector.load %arg14[%c0_70, %c0_71, %c0_72] : memref<1x128x32xbf16, #tpu.memory_space<vmem>>, vector<1x128x32xbf16>
    %178 = vector.shape_cast %177 : vector<1x128x32xbf16> to vector<128x32xbf16>
    %cst_73 = arith.constant dense<0.000000e+00> : vector<9x32xf32>
    %179 = tpu.matmul %176, %178, %cst_73 {dimension_numbers = #tpu.dot_dimension_numbers<[1], [0], [0], [1], [0, 0, 1, 1], [], []>} : vector<9x128xbf16>, vector<128x32xbf16>, vector<9x32xf32> -> vector<9x32xf32>
    %c0_74 = arith.constant 0 : index
    %c0_75 = arith.constant 0 : index
    %c0_76 = arith.constant 0 : index
    %180 = vector.load %arg15[%c0_74, %c0_75, %c0_76] : memref<1x1x32xf32, #tpu.memory_space<vmem>>, vector<1x1x32xf32>
    %181 = vector.shape_cast %180 : vector<1x1x32xf32> to vector<1x32xf32>
    %182 = vector.broadcast %181 : vector<1x32xf32> to vector<9x32xf32>
    %183 = arith.addf %179, %182 : vector<9x32xf32>
    %184 = arith.addf %135, %183 : vector<9x32xf32>
    %c0_77 = arith.constant 0 : index
    %c0_78 = arith.constant 0 : index
    %c0_79 = arith.constant 0 : index
    %185 = vector.load %arg16[%c0_77, %c0_78, %c0_79] : memref<1x9x32xf32, #tpu.memory_space<vmem>>, vector<1x9x32xf32>
    %186 = vector.shape_cast %185 : vector<1x9x32xf32> to vector<9x32xf32>
    %187 = vector.shape_cast %184 : vector<9x32xf32> to vector<1x9x32xf32>
    tpu.vector_store %arg16[%c0_77, %c0_78, %c0_79], %187 {strides = array<i32>} : memref<1x9x32xf32, #tpu.memory_space<vmem>>, vector<1x9x32xf32>,
    %188 = vector.extract_strided_slice %184 {offsets = [5, 0], sizes = [4, 32], strides = [1, 1]} : vector<9x32xf32> to vector<4x32xf32>
    %c0_80 = arith.constant 0 : index
    %c0_81 = arith.constant 0 : index
    %c0_82 = arith.constant 0 : index
    %c0_83 = arith.constant 0 : index
    %189 = vector.load %arg17[%c0_80, %c0_81, %c0_82, %c0_83] : memref<1x1x4x32xf32, #tpu.memory_space<vmem>>, vector<1x1x4x32xf32>
    %190 = vector.shape_cast %189 : vector<1x1x4x32xf32> to vector<4x32xf32>
    %191 = vector.shape_cast %188 : vector<4x32xf32> to vector<1x1x4x32xf32>
    tpu.vector_store %arg17[%c0_80, %c0_81, %c0_82, %c0_83], %191 {strides = array<i32>} : memref<1x1x4x32xf32, #tpu.memory_space<vmem>>, vector<1x1x4x32xf32>,
    return
  }
  func.func @transform_0(%arg0: i32, %arg1: i32) -> (i32, i32, i32) {
    %c0_i32 = arith.constant 0 : i32
    %c0_i32_0 = arith.constant 0 : i32
    %c0_i32_1 = arith.constant 0 : i32
    return %arg0, %c0_i32, %c0_i32_0 : i32, i32, i32
  }
  func.func @transform_1(%arg0: i32, %arg1: i32) -> (i32, i32, i32) {
    %c0_i32 = arith.constant 0 : i32
    %c0_i32_0 = arith.constant 0 : i32
    %c0_i32_1 = arith.constant 0 : i32
    return %arg1, %c0_i32, %c0_i32_0 : i32, i32, i32
  }
  func.func @transform_2(%arg0: i32, %arg1: i32) -> (i32, i32, i32) {
    %c0_i32 = arith.constant 0 : i32
    %c0_i32_0 = arith.constant 0 : i32
    %c0_i32_1 = arith.constant 0 : i32
    return %arg1, %c0_i32, %c0_i32_0 : i32, i32, i32
  }
  func.func @transform_3(%arg0: i32, %arg1: i32) -> (i32, i32, i32) {
    %c0_i32 = arith.constant 0 : i32
    %c0_i32_0 = arith.constant 0 : i32
    %c0_i32_1 = arith.constant 0 : i32
    return %arg1, %c0_i32, %c0_i32_0 : i32, i32, i32
  }
  func.func @transform_4(%arg0: i32, %arg1: i32) -> (i32, i32, i32) {
    %c0_i32 = arith.constant 0 : i32
    %c0_i32_0 = arith.constant 0 : i32
    %c0_i32_1 = arith.constant 0 : i32
    return %arg1, %c0_i32, %c0_i32_0 : i32, i32, i32
  }
  func.func @transform_5(%arg0: i32, %arg1: i32) -> (i32, i32, i32) {
    %c0_i32 = arith.constant 0 : i32
    %c0_i32_0 = arith.constant 0 : i32
    %c0_i32_1 = arith.constant 0 : i32
    return %arg1, %c0_i32, %c0_i32_0 : i32, i32, i32
  }
  func.func @transform_6(%arg0: i32, %arg1: i32) -> (i32, i32, i32) {
    %c0_i32 = arith.constant 0 : i32
    %c0_i32_0 = arith.constant 0 : i32
    %c0_i32_1 = arith.constant 0 : i32
    return %arg1, %c0_i32, %c0_i32_0 : i32, i32, i32
  }
  func.func @transform_7(%arg0: i32, %arg1: i32) -> (i32, i32, i32) {
    %c0_i32 = arith.constant 0 : i32
    %c0_i32_0 = arith.constant 0 : i32
    %c0_i32_1 = arith.constant 0 : i32
    return %arg1, %c0_i32, %c0_i32_0 : i32, i32, i32
  }
  func.func @transform_8(%arg0: i32, %arg1: i32) -> (i32, i32, i32) {
    %c0_i32 = arith.constant 0 : i32
    %c0_i32_0 = arith.constant 0 : i32
    %c0_i32_1 = arith.constant 0 : i32
    return %arg1, %c0_i32, %c0_i32_0 : i32, i32, i32
  }
  func.func @transform_9(%arg0: i32, %arg1: i32) -> (i32, i32, i32) {
    %c0_i32 = arith.constant 0 : i32
    %c0_i32_0 = arith.constant 0 : i32
    %c0_i32_1 = arith.constant 0 : i32
    return %arg1, %c0_i32, %c0_i32_0 : i32, i32, i32
  }
  func.func @transform_10(%arg0: i32, %arg1: i32) -> (i32, i32, i32) {
    %c0_i32 = arith.constant 0 : i32
    %c0_i32_0 = arith.constant 0 : i32
    %c0_i32_1 = arith.constant 0 : i32
    return %arg1, %c0_i32, %c0_i32_0 : i32, i32, i32
  }
  func.func @transform_11(%arg0: i32, %arg1: i32) -> (i32, i32, i32) {
    %c0_i32 = arith.constant 0 : i32
    %c0_i32_0 = arith.constant 0 : i32
    %c0_i32_1 = arith.constant 0 : i32
    return %arg1, %c0_i32, %c0_i32_0 : i32, i32, i32
  }
  func.func @transform_12(%arg0: i32, %arg1: i32) -> (i32, i32, i32) {
    %c0_i32 = arith.constant 0 : i32
    %c0_i32_0 = arith.constant 0 : i32
    %c0_i32_1 = arith.constant 0 : i32
    return %arg1, %c0_i32, %c0_i32_0 : i32, i32, i32
  }
  func.func @transform_13(%arg0: i32, %arg1: i32) -> (i32, i32, i32) {
    %c0_i32 = arith.constant 0 : i32
    %c0_i32_0 = arith.constant 0 : i32
    %c0_i32_1 = arith.constant 0 : i32
    return %arg1, %c0_i32, %c0_i32_0 : i32, i32, i32
  }
  func.func @transform_14(%arg0: i32, %arg1: i32) -> (i32, i32, i32) {
    %c0_i32 = arith.constant 0 : i32
    %c0_i32_0 = arith.constant 0 : i32
    %c0_i32_1 = arith.constant 0 : i32
    return %arg0, %c0_i32, %c0_i32_0 : i32, i32, i32
  }
  func.func @transform_15(%arg0: i32, %arg1: i32) -> (i32, i32, i32, i32) {
    %c0_i32 = arith.constant 0 : i32
    %c0_i32_0 = arith.constant 0 : i32
    %c0_i32_1 = arith.constant 0 : i32
    return %arg1, %arg0, %c0_i32, %c0_i32_0 : i32, i32, i32, i32
  }
}

module attributes {stable_mosaic.version = 11 : i64} {
  func.func @_head_kernel(%arg0: memref<2x32xf32, #tpu.memory_space<vmem>>, %arg1: memref<1x32xf32, #tpu.memory_space<vmem>>, %arg2: memref<1x32xf32, #tpu.memory_space<vmem>>, %arg3: memref<1x32xf32, #tpu.memory_space<vmem>>, %arg4: memref<1x32xf32, #tpu.memory_space<vmem>>, %arg5: memref<32x16xbf16, #tpu.memory_space<vmem>>, %arg6: memref<2x16xf32, #tpu.memory_space<vmem>>) attributes {dimension_semantics = [], scalar_prefetch = 0 : i64, scratch_operands = 0 : i64, tpu.core_type = #tpu.core_type<tc>} {
    %c0 = arith.constant 0 : index
    %c0_0 = arith.constant 0 : index
    %0 = vector.load %arg0[%c0, %c0_0] : memref<2x32xf32, #tpu.memory_space<vmem>>, vector<2x32xf32>
    %c0_1 = arith.constant 0 : index
    %c0_2 = arith.constant 0 : index
    %1 = vector.load %arg1[%c0_1, %c0_2] : memref<1x32xf32, #tpu.memory_space<vmem>>, vector<1x32xf32>
    %c0_3 = arith.constant 0 : index
    %c0_4 = arith.constant 0 : index
    %2 = vector.load %arg2[%c0_3, %c0_4] : memref<1x32xf32, #tpu.memory_space<vmem>>, vector<1x32xf32>
    %cst = arith.constant dense<0.000000e+00> : vector<2xf32>
    %3 = vector.multi_reduction <add>, %0, %cst [1] : vector<2x32xf32> to vector<2xf32>
    %4 = vector.shape_cast %3 : vector<2xf32> to vector<2x1xf32>
    %cst_5 = arith.constant 3.200000e+01 : f32
    %5 = vector.broadcast %cst_5 : f32 to vector<2x1xf32>
    %6 = arith.divf %4, %5 : vector<2x1xf32>
    %7 = vector.broadcast %6 : vector<2x1xf32> to vector<2x32xf32>
    %8 = arith.subf %0, %7 : vector<2x32xf32>
    %9 = arith.mulf %8, %8 : vector<2x32xf32>
    %cst_6 = arith.constant dense<0.000000e+00> : vector<2xf32>
    %10 = vector.multi_reduction <add>, %9, %cst_6 [1] : vector<2x32xf32> to vector<2xf32>
    %11 = vector.shape_cast %10 : vector<2xf32> to vector<2x1xf32>
    %cst_7 = arith.constant 3.200000e+01 : f32
    %12 = vector.broadcast %cst_7 : f32 to vector<2x1xf32>
    %13 = arith.divf %11, %12 : vector<2x1xf32>
    %cst_8 = arith.constant 9.99999997E-7 : f32
    %14 = vector.broadcast %cst_8 : f32 to vector<2x1xf32>
    %15 = arith.addf %13, %14 : vector<2x1xf32>
    %16 = math.rsqrt %15 : vector<2x1xf32>
    %17 = vector.broadcast %16 : vector<2x1xf32> to vector<2x32xf32>
    %18 = arith.mulf %8, %17 : vector<2x32xf32>
    %19 = vector.broadcast %1 : vector<1x32xf32> to vector<2x32xf32>
    %20 = arith.mulf %18, %19 : vector<2x32xf32>
    %21 = vector.broadcast %2 : vector<1x32xf32> to vector<2x32xf32>
    %22 = arith.addf %20, %21 : vector<2x32xf32>
    %c0_9 = arith.constant 0 : index
    %c0_10 = arith.constant 0 : index
    %23 = vector.load %arg3[%c0_9, %c0_10] : memref<1x32xf32, #tpu.memory_space<vmem>>, vector<1x32xf32>
    %c0_11 = arith.constant 0 : index
    %c0_12 = arith.constant 0 : index
    %24 = vector.load %arg4[%c0_11, %c0_12] : memref<1x32xf32, #tpu.memory_space<vmem>>, vector<1x32xf32>
    %cst_13 = arith.constant dense<0.000000e+00> : vector<2xf32>
    %25 = vector.multi_reduction <add>, %22, %cst_13 [1] : vector<2x32xf32> to vector<2xf32>
    %26 = vector.shape_cast %25 : vector<2xf32> to vector<2x1xf32>
    %cst_14 = arith.constant 3.200000e+01 : f32
    %27 = vector.broadcast %cst_14 : f32 to vector<2x1xf32>
    %28 = arith.divf %26, %27 : vector<2x1xf32>
    %29 = vector.broadcast %28 : vector<2x1xf32> to vector<2x32xf32>
    %30 = arith.subf %22, %29 : vector<2x32xf32>
    %31 = arith.mulf %30, %30 : vector<2x32xf32>
    %cst_15 = arith.constant dense<0.000000e+00> : vector<2xf32>
    %32 = vector.multi_reduction <add>, %31, %cst_15 [1] : vector<2x32xf32> to vector<2xf32>
    %33 = vector.shape_cast %32 : vector<2xf32> to vector<2x1xf32>
    %cst_16 = arith.constant 3.200000e+01 : f32
    %34 = vector.broadcast %cst_16 : f32 to vector<2x1xf32>
    %35 = arith.divf %33, %34 : vector<2x1xf32>
    %cst_17 = arith.constant 9.99999974E-6 : f32
    %36 = vector.broadcast %cst_17 : f32 to vector<2x1xf32>
    %37 = arith.addf %35, %36 : vector<2x1xf32>
    %38 = math.rsqrt %37 : vector<2x1xf32>
    %39 = vector.broadcast %38 : vector<2x1xf32> to vector<2x32xf32>
    %40 = arith.mulf %30, %39 : vector<2x32xf32>
    %41 = vector.broadcast %23 : vector<1x32xf32> to vector<2x32xf32>
    %42 = arith.mulf %40, %41 : vector<2x32xf32>
    %43 = vector.broadcast %24 : vector<1x32xf32> to vector<2x32xf32>
    %44 = arith.addf %42, %43 : vector<2x32xf32>
    %45 = arith.truncf %44 : vector<2x32xf32> to vector<2x32xbf16>
    %c0_18 = arith.constant 0 : index
    %c0_19 = arith.constant 0 : index
    %46 = vector.load %arg5[%c0_18, %c0_19] : memref<32x16xbf16, #tpu.memory_space<vmem>>, vector<32x16xbf16>
    %cst_20 = arith.constant dense<0.000000e+00> : vector<2x16xf32>
    %47 = tpu.matmul %45, %46, %cst_20 {dimension_numbers = #tpu.dot_dimension_numbers<[1], [0], [0], [1], [0, 0, 1, 1], [], []>} : vector<2x32xbf16>, vector<32x16xbf16>, vector<2x16xf32> -> vector<2x16xf32>
    %48 = arith.mulf %47, %47 : vector<2x16xf32>
    %cst_21 = arith.constant dense<0.000000e+00> : vector<2xf32>
    %49 = vector.multi_reduction <add>, %48, %cst_21 [1] : vector<2x16xf32> to vector<2xf32>
    %50 = vector.shape_cast %49 : vector<2xf32> to vector<2x1xf32>
    %51 = math.rsqrt %50 : vector<2x1xf32>
    %52 = vector.broadcast %51 : vector<2x1xf32> to vector<2x16xf32>
    %53 = arith.mulf %47, %52 : vector<2x16xf32>
    %c0_22 = arith.constant 0 : index
    %c0_23 = arith.constant 0 : index
    %54 = vector.load %arg6[%c0_22, %c0_23] : memref<2x16xf32, #tpu.memory_space<vmem>>, vector<2x16xf32>
    tpu.vector_store %arg6[%c0_22, %c0_23], %53 {strides = array<i32>} : memref<2x16xf32, #tpu.memory_space<vmem>>, vector<2x16xf32>,
    return
  }
}

</mosaic_0001>

<bundles_post_ra>
// kernel: vpt_clip_vit_forward.4
= control target key start
LH: loop header
LB: loop body
LE: loop exit
PB: predicated region body
PF: predicated region fallthrough
CT: control target
= control target key end

     0   :  { %v117_v0 = vmov 0.0   ;;  %vm118_vm0 = vmmov 0   ;;  %vm45_vm1 = vcmask 261120   ;;  %s157_s1 = inlined_call_operand.vmem [shape: bf16[32,32], index: 1, kind: input, shape index: {}]   ;;  %s158_s0 = inlined_call_operand.vmem [shape: bf16[16,32], index: 0, kind: input, shape index: {}]   ;;  %s159_s2 = inlined_call_operand.vmem [shape: f32[1,32], index: 2, kind: input, shape index: {}]   ;;  %s160_s3 = inlined_call_operand.vmem [shape: f32[16,32], index: 3, kind: output, shape index: {}]  }
   0x1   :  { %104 = vmatprep.subr.bf16.mxu0 %v117_v0  ;;  %v114_v1 = vld [vmem:[%s157_s1] sm:$0xff]   ;;  %108 = vmatprep.mubr.msk.bf16.mxu0 %vm118_vm0, %v117_v0  ;;  %v115_v2 = vld [vmem:[%s157_s1 + $0x8] sm:$0xff]  }
   0x2   :  { %105 = vmatpush3.bf16.msra.mxu0 %v114_v1  ;;  %v116_v3 = vld [vmem:[%s158_s0] sm:$0xff]  }
   0x3   :  { %106 = vmatprep.subr.bf16.mxu0 %v117_v0  ;;  %v96_v4 = vld [vmem:[%s159_s2] ss:$0 sm:$0xff] }
   0x6   :  { %107 = vmatpush3.bf16.msra.mxu0 %v115_v2 }
   0x9   :  { %109 = vmatmul.mubr.msk.bf16.vlgmr.msra.gmra.mrb[0].mxu0 %vm45_vm1, %v116_v3 }
  0xdc   :  { %v83_v5 = vpop.f32.mrb[0].mxu0 }
  0xdd   :  { %v84_v6 = vadd.f32 %v96_v4, %v83_v5  ;;  %v110_v7 = vpop.f32.mrb[1].mxu0 }
  0xde   :  { %v86_v8 = vpop.f32.mrb[2].mxu0 }
  0xdf   :  { %90 = vst.msk [vmem:[%s160_s3] sm:$0xff] %vm45_vm1, %v84_v6  ;;  %v87_v9 = vadd.f32 %v96_v4, %v86_v8  ;;  %v111_v10 = vpop.f32.mrb[3].mxu0 }
  0xe1   :  { %91 = vst.msk [vmem:[%s160_s3 + $0x8] sm:$0xff] %vm45_vm1, %v87_v9 }

// kernel: vpt_clip_vit_forward.7
= control target key start
LH: loop header
LB: loop body
LE: loop exit
PB: predicated region body
PF: predicated region fallthrough
CT: control target
= control target key end

     0   :  { %vm28_vm0 = vcmask 254976   ;;  %s297_s0 = inlined_call_operand.vmem [shape: f32[2,32], index: 0, kind: input, shape index: {}]   ;;  %s298_s1 = inlined_call_operand.vmem [shape: f32[1,32], index: 1, kind: input, shape index: {}]   ;;  %s299_s2 = inlined_call_operand.vmem [shape: f32[1,32], index: 2, kind: input, shape index: {}]   ;;  %s300_s3 = inlined_call_operand.vmem [shape: f32[1,32], index: 3, kind: input, shape index: {}]   ;;  %s301_s4 = inlined_call_operand.vmem [shape: f32[1,32], index: 4, kind: input, shape index: {}]   ;;  %s302_s5 = inlined_call_operand.vmem [shape: bf16[32,16], index: 5, kind: input, shape index: {}]   ;;  %s303_s6 = inlined_call_operand.hbm [shape: f32[2,16], index: 6, kind: output, shape index: {}]  }
   0x1   :  { %v25_v0 = vld [vmem:[%s297_s0] sm:$0x3] }
   0x2   :  { %v29_v1 = vsel %vm28_vm0, %v25_v0, 0.0 }
   0x3   :  { %30 = vadd.xlane.f32.xlu0 %v29_v1 }
   0x4   :  { %11 = vsyncpa [#allocation3], 0  ;;  %v169_v11 = vld [vmem:[%s298_s1] ss:$0 sm:$0xff]  ;;  %v222_v23 = vmov 0.0   ;;  %v191_v24 = vld [vmem:[%s302_s5 + $0x8] sm:$0xff]  }
   0x5   :  { %v170_v13 = vld [vmem:[%s299_s2] ss:$0 sm:$0xff]  ;;  %179 = vmatprep.subr.bf16.mxu0 %v222_v23  ;;  %vm223_vm1 = vmmov 0   ;;  %vm103_vm2 = vcmask 261120   ;;  %vm148_vm3 = vcmask 123904  }
   0x6   :  { %v190_v22 = vld [vmem:[%s302_s5] sm:$0xff]   ;;  %183 = vmatprep.mubr.msk.bf16.mxu0 %vm223_vm1, %v222_v23 }
   0x7   :  { %180 = vmatpush3.bf16.msra.mxu0 %v190_v22  ;;  %v171_v29 = vld [vmem:[%s300_s3] ss:$0 sm:$0xff]  ;;  %s224_s3 = smov [#allocation2]  }
   0x8   :  { %181 = vmatprep.subr.bf16.mxu0 %v222_v23  ;;  %v172_v31 = vld [vmem:[%s301_s4] ss:$0 sm:$0xff]  ;;  %s161_s5 = sshll.u32 %s224_s3, 4  ;;  %s162_s5 = int_to_ptr.vmem [resolvable:$true] %s161_s5 }
   0x9   :  { %s198_s4 = scalar_lea.vmem %s162_s5, 32  ;;  %p203_p1 = scmp.lt.s32.totalorder %s162_s5, %s162_s5 }
   0xa   :  { %p199_p0 = scmp.ne.s32.totalorder %s162_s5, %s198_s4  ;;  %p204_p2 = scmp.lt.s32.totalorder %s198_s4, %s198_s4 }
   0xb   :  { %182 = vmatpush3.bf16.msra.mxu0 %v191_v24 }
   0xc   :  { %p205_p3 = por %p204_p2, %p203_p1 }
   0xe   :  { %p206_p4 = pnand %p205_p3, %p199_p0 }
  0x90   :  { %v31_v2 = vpop.xlane.xlu0 %30 }
  0x91   :  { %v33_v3 = vmul.f32 0.03125, %v31_v2 }
  0x93   :  { %v34_v4 = vsub.f32 %v25_v0, %v33_v3 }
  0x95   :  { %v35_v5 = vmul.f32 %v34_v4, %v34_v4 }
  0x97   :  { %v36_v6 = vsel %vm28_vm0, %v35_v5, 0.0 }
  0x98   :  { %37 = vadd.xlane.f32.xlu0 %v36_v6 }
 0x125   :  { %v38_v7 = vpop.xlane.xlu0 %37 }
 0x126   :  { %v39_v8 = vmul.f32 0.03125, %v38_v7 }
 0x128   :  { %v40_v9 = vadd.f32 1e-06, %v39_v8 }
 0x12a   :  { %192 = vrsqrt.f32 %v40_v9 }
 0x134   :  { %v193_v10 = vpop.eup %192 }
 0x135   :  { %v42_v12 = vmul.f32 %v193_v10, %v34_v4 }
 0x137   :  { %v49_v14 = vmul.f32 %v169_v11, %v42_v12 }
 0x139   :  { %v56_v15 = vadd.f32 %v170_v13, %v49_v14 }
 0x13b   :  { %v59_v16 = vsel %vm28_vm0, %v56_v15, 0.0 }
 0x13c   :  { %60 = vadd.xlane.f32.xlu1 %v59_v16 }
 0x1c9   :  { %v61_v17 = vpop.xlane.xlu1 %60 }
 0x1ca   :  { %v62_v18 = vmul.f32 0.03125, %v61_v17 }
 0x1cc   :  { %v63_v19 = vsub.f32 %v56_v15, %v62_v18 }
 0x1ce   :  { %v64_v20 = vmul.f32 %v63_v19, %v63_v19 }
 0x1d0   :  { %v65_v21 = vsel %vm28_vm0, %v64_v20, 0.0 }
 0x1d1   :  { %66 = vadd.xlane.f32.xlu1 %v65_v21 }
 0x25e   :  { %v67_v25 = vpop.xlane.xlu1 %66 }
 0x25f   :  { %v68_v26 = vmul.f32 0.03125, %v67_v25 }
 0x261   :  { %v69_v27 = vadd.f32 1e-05, %v68_v26 }
 0x263   :  { %194 = vrsqrt.f32 %v69_v27 }
 0x26d   :  { %v195_v28 = vpop.eup %194 }
 0x26e   :  { %v71_v30 = vmul.f32 %v195_v28, %v63_v19 }
 0x270   :  { %v78_v32 = vmul.f32 %v171_v29, %v71_v30 }
 0x272   :  { %v85_v33 = vadd.f32 %v172_v31, %v78_v32 }
 0x274   :  { %v86_v34 = vpack.c.bf16 %v85_v33, %v85_v33 }
 0x276   :  { %184 = vmatmul.mubr.msk.bf16.vlgmr.msra.gmra.mrb[0].mxu0 %vm103_vm2, %v86_v34 }
 0x349   :  { %v141_v35 = vpop.f32.mrb[0].mxu0 }
 0x34a   :  { %v147_v36 = vmul.f32 %v141_v35, %v141_v35  ;;  %v185_v37 = vpop.f32.mrb[1].mxu0 }
 0x34b   :  { %v144_v38 = vpop.f32.mrb[2].mxu0 }
 0x34c   :  { %v186_v39 = vpop.f32.mrb[3].mxu0  ;;  %v149_v40 = vsel %vm148_vm3, %v147_v36, 0.0 }
 0x34d   :  { %150 = vadd.xlane.f32.xlu0 %v149_v40 }
 0x3da   :  { %v151_v41 = vpop.xlane.xlu0 %150 }
 0x3db   :  { %196 = vrsqrt.f32 %v151_v41 }
 0x3e5   :  { %v197_v42 = vpop.eup %196 }
 0x3e6   :  { %v153_v43 = vmul.f32 %v197_v42, %v141_v35 }
 0x3e8   :  { %154 = vst.msk [vmem:[#allocation2] sm:$0x3] %vm148_vm3, %v153_v43 }
 0x3e9   :  { %209 = shalt.err (!%p206_p4)
}
 0x3ea   :  { %s210_s10 = scalar_lea.hbm %s303_s6, 32 }
 0x3eb   :  { %p211_p5 = scmp.ne.s32.totalorder %s303_s6, %s210_s10  ;;  %p214_p6 = scmp.lt.u32.totalorder %s210_s10, %s303_s6 }
 0x3ed   :  { %p216_p7 = pnand %p214_p6, %p211_p5 }
 0x3ef   :  { %219 = shalt.err (!%p216_p7)
}
 0x3f0   :  { %164 = dma.vmem_to_hbm [thread:$0]  %s162_s5, 32, %s303_s6, [#allocation3]  }
 0x3f1   :  { %220 = dma.done.wait [#allocation3], 32  }
 0x3f2   :  { %221 = vsyncadd [#allocation3], 4294967264 }
 0x3f3   :  { %168 = vsyncpa [#allocation3], 1 }

// kernel: vpt_clip_vit_forward.5
= control target key start
LH: loop header
LB: loop body
LE: loop exit
PB: predicated region body
PF: predicated region fallthrough
CT: control target
= control target key end

     0   :  { %s1164_s24 = smov 0   ;;  %s1354_s0 = inlined_call_operand.vmem [shape: bf16[2,4,768], index: 0, kind: input, shape index: {}]   ;;  %s1355_s1 = inlined_call_operand.vmem [shape: bf16[768,32], index: 1, kind: input, shape index: {}]   ;;  %s1356_s2 = inlined_call_operand.vmem [shape: f32[1,32], index: 2, kind: input, shape index: {}]   ;;  %s1357_s3 = inlined_call_operand.vmem [shape: f32[4,32], index: 3, kind: input, shape index: {}]   ;;  %s1358_s4 = inlined_call_operand.vmem [shape: f32[4,32], index: 4, kind: input, shape index: {}]   ;;  %s1359_s5 = inlined_call_operand.vmem [shape: f32[1,32], index: 5, kind: input, shape index: {}]   ;;  %s1360_s6 = inlined_call_operand.vmem [shape: f32[1,32], index: 6, kind: input, shape index: {}]   ;;  %s1361_s7 = inlined_call_operand.vmem [shape: f32[2,9,32], index: 7, kind: output, shape index: {}]  }
   0x1 LB: > { %s926_s25 = sadd.s32 4294967295, %s1121_s24   ;;  %p930_p0 = scmp.ge.s32.totalorder %s1121_s24, 1  ;;  %s1121_s24 = sphi %s1164_s24, %s17_s24  }
   0x2   : > { %p237_p1 = scmp.lt.s32.totalorder %s1121_s24, 3 }
   0x4   : > { %p238_p2 = pnand %p930_p0, %p237_p1 }
   0x5   : > { %v1064_v0 = vld [vmem:[%s1355_s1 + $0x40] sm:$0xff] (!%p238_p2)   ;;  %v1068_v4 = vld [vmem:[%s1355_s1 + $0x48] sm:$0xff] (!%p238_p2)   ;;  %v1072_v8 = vld [vmem:[%s1355_s1 + $0x50] sm:$0xff] (!%p238_p2)   ;;  %p269_p3 = scmp.lt.s32.totalorder (!%p238_p2), %s926_s25, 1  ;;  %v386_v27 = vlaneseq (!%p238_p2)  ;;  %v1123_v35 = vmov (!%p238_p2), 1983009808  }
   0x6   : > { %241 = sbr.rel (%p238_p2) target bundleno = 607 (0x25f), region = 48  ;;  %v1065_v1 = vld [vmem:[%s1355_s1] sm:$0xff] (!%p238_p2)   ;;  %988 = vmatprep.subr.bf16.mxu0 (!%p238_p2), %v1064_v0  ;;  %v1069_v5 = vld [vmem:[%s1355_s1 + $0x8] sm:$0xff] (!%p238_p2)   ;;  %v1073_v9 = vld [vmem:[%s1355_s1 + $0x10] sm:$0xff] (!%p238_p2)   ;;  %v384_v36 = vunpack.c.l.s4 (!%p238_p2), %v1123_v35  ;;  %vm824_vm0 = vcmask (!%p238_p2), 1040384   ;;  %vm828_vm1 = vcmask (!%p238_p2), 258048  }
   0x7   : > { %v1066_v2 = vld [vmem:[%s1355_s1 + $0xc0] sm:$0xff] (!%p238_p2)   ;;  %989 = vmatpush3.bf16.msra.mxu0 (!%p238_p2), %v1065_v1  ;;  %v1070_v6 = vld [vmem:[%s1355_s1 + $0xc8] sm:$0xff] (!%p238_p2)   ;;  %v1074_v10 = vld [vmem:[%s1355_s1 + $0xd0] sm:$0xff] (!%p238_p2)   ;;  %v387_v32 = vshrl.u32 (!%p238_p2), %v386_v27, 7  ;;  %vm865_vm2 = vcmask (!%p238_p2), 1044480   ;;  %vm869_vm3 = vcmask (!%p238_p2), 253952  }
   0x8   : > { %v1067_v3 = vld [vmem:[%s1355_s1 + $0x80] sm:$0xff] (!%p238_p2)   ;;  %1010 = vmatprep.subr.bf16.mxu1 (!%p238_p2), %v1066_v2  ;;  %990 = vmatprep.subr.bf16.mxu0 (!%p238_p2), %v1068_v4  ;;  %v1071_v7 = vld [vmem:[%s1355_s1 + $0x88] sm:$0xff] (!%p238_p2)   ;;  %v1075_v11 = vld [vmem:[%s1355_s1 + $0x90] sm:$0xff] (!%p238_p2)   ;;  %v385_v38 = vunpack.c.0.s8 (!%p238_p2), %v384_v36  ;;  %vm867_vm4 = vcmask (!%p238_p2), 261120  }
   0x9   : > { %1011 = vmatpush3.bf16.msra.mxu1 (!%p238_p2), %v1067_v3  ;;  %v1076_v12 = vld [vmem:[%s1355_s1 + $0x58] sm:$0xff] (!%p238_p2)   ;;  %v1080_v16 = vld [vmem:[%s1355_s1 + $0x60] sm:$0xff] (!%p238_p2)   ;;  %v1084_v20 = vld [vmem:[%s1355_s1 + $0x68] sm:$0xff] (!%p238_p2)  }
   0xa   : > { %1012 = vmatprep.subr.bf16.mxu1 (!%p238_p2), %v1070_v6  ;;  %v1077_v13 = vld [vmem:[%s1355_s1 + $0x18] sm:$0xff] (!%p238_p2)   ;;  %v1081_v17 = vld [vmem:[%s1355_s1 + $0x20] sm:$0xff] (!%p238_p2)   ;;  %v1085_v21 = vld [vmem:[%s1355_s1 + $0x28] sm:$0xff] (!%p238_p2)   ;;  %v388_v40 = vsub.s32 (!%p238_p2), %v385_v38, %v387_v32 }
   0xb   : > { %991 = vmatpush3.bf16.msra.mxu0 (!%p238_p2), %v1069_v5  ;;  %v1078_v14 = vld [vmem:[%s1355_s1 + $0xd8] sm:$0xff] (!%p238_p2)   ;;  %v1082_v18 = vld [vmem:[%s1355_s1 + $0xe0] sm:$0xff] (!%p238_p2)   ;;  %v1086_v22 = vld [vmem:[%s1355_s1 + $0xe8] sm:$0xff] (!%p238_p2)  }
   0xc   : > { %992 = vmatprep.subr.bf16.mxu0 (!%p238_p2), %v1072_v8  ;;  %v1079_v15 = vld [vmem:[%s1355_s1 + $0x98] sm:$0xff] (!%p238_p2)   ;;  %v1083_v19 = vld [vmem:[%s1355_s1 + $0xa0] sm:$0xff] (!%p238_p2)   ;;  %v1087_v23 = vld [vmem:[%s1355_s1 + $0xa8] sm:$0xff] (!%p238_p2)  }
   0xd   : > { %1013 = vmatpush3.bf16.msra.mxu1 %v1071_v7  ;;  %s1363_s25 = smov (!%p269_p3, %s926_s25), 1  ;;  %v1088_v24 = vld [vmem:[%s1355_s1 + $0x70] sm:$0xff]   ;;  %v1092_v29 = vld [vmem:[%s1355_s1 + $0x78] sm:$0xff]   ;;  %v1096_v37 = vld [vmem:[%s1355_s1 + $0x140] sm:$0xff]  }
   0xe   : > { %1014 = vmatprep.subr.bf16.mxu1 %v1074_v10  ;;  %s1054_s11 = smul.u32 12, %s1363_s25  ;;  %v1089_v25 = vld [vmem:[%s1355_s1 + $0x30] sm:$0xff]   ;;  %v1093_v30 = vld [vmem:[%s1355_s1 + $0x38] sm:$0xff]   ;;  %v1098_v45 = vld [vmem:[%s1355_s1 + $0x100] sm:$0xff]   ;;  %s987_s8 = sshll.u32 %s1363_s25, 4 }
   0xf   : > { %993 = vmatpush3.bf16.msra.mxu0 %v1073_v9  ;;  %v1090_v26 = vld [vmem:[%s1355_s1 + $0xf0] sm:$0xff]   ;;  %v1094_v31 = vld [vmem:[%s1355_s1 + $0xf8] sm:$0xff]   ;;  %v1099_v46 = vld [vmem:[%s1355_s1 + $0x148] sm:$0xff]  }
  0x10   : > { %994 = vmatprep.subr.bf16.mxu0 %v1076_v12  ;;  %v1091_v28 = vld [vmem:[%s1355_s1 + $0xb0] sm:$0xff]   ;;  %s1269_s22 = scalar_lea.vmem %s1354_s0, %s1054_s11  ;;  %v1095_v34 = vld [vmem:[%s1355_s1 + $0xb8] sm:$0xff]   ;;  %v1100_v47 = vld [vmem:[%s1355_s1 + $0x108] sm:$0xff]   ;;  %s278_s11 = scalar_lea.vmem %s1361_s7, %s987_s8 }
  0x11   : > { %1015 = vmatpush3.bf16.msra.mxu1 %v1075_v11  ;;  %v280_v33 = vld [vmem:[%s1269_s22] sm:$0xff]  ;;  %v1101_v48 = vld [vmem:[%s1355_s1 + $0x150] sm:$0xff]   ;;  %v934_v50 = vld.sshfl [vmem:[%s1269_s22 + $0x8] sm:$0x33 pattern:$0x76325410] }
  0x12   : > { %1016 = vmatprep.subr.bf16.mxu1 %v1078_v14  ;;  %v382_v39 = vcombine.high %v280_v33, %v280_v33  ;;  %v389_v41 = vrot.slane %v280_v33, %v388_v40  ;;  %v1102_v49 = vld [vmem:[%s1355_s1 + $0x110] sm:$0xff]   ;;  %v1103_v51 = vld [vmem:[%s1355_s1 + $0x158] sm:$0xff]   ;;  %v406_v52 = vcombine.high %v934_v50, %v934_v50  ;;  %v1105_v54 = vld [vmem:[%s1355_s1 + $0x160] sm:$0xff]  }
  0x13   : > { %995 = vmatpush3.bf16.msra.mxu0 %v1077_v13  ;;  %v1104_v53 = vld [vmem:[%s1355_s1 + $0x118] sm:$0xff]   ;;  %v1106_v55 = vld [vmem:[%s1355_s1 + $0x120] sm:$0xff]   ;;  %v1107_v56 = vld [vmem:[%s1355_s1 + $0x168] sm:$0xff]  }
  0x14   : > { %996 = vmatprep.subr.bf16.mxu0 %v1080_v16  ;;  %v396_v42 = vrot.slane %v382_v39, %v388_v40  ;;  %v397_v43 = vcombine.high %v389_v41, %v389_v41  ;;  %v1108_v57 = vld [vmem:[%s1355_s1 + $0x128] sm:$0xff]   ;;  %v1109_v58 = vld [vmem:[%s1355_s1 + $0x170] sm:$0xff]   ;;  %v1111_v60 = vld [vmem:[%s1355_s1 + $0x178] sm:$0xff]  }
  0x15   : > { %1017 = vmatpush3.bf16.msra.mxu1 %v1079_v15  ;;  %v1110_v59 = vld [vmem:[%s1355_s1 + $0x130] sm:$0xff]   ;;  %v1112_v61 = vld [vmem:[%s1355_s1 + $0x138] sm:$0xff]   ;;  %v379_v0 = vld [vmem:[%s1357_s3] sm:$0xf] }
  0x16   : > { %1018 = vmatprep.subr.bf16.mxu1 %v1082_v18  ;;  %v398_v44 = vcombine.high %v396_v42, %v396_v42  ;;  %733 = vmatprep.mubr.bf16.mxu0 %v397_v43  ;;  %v984_v33 = vld [vmem:[%s1360_s6] ss:$0 sm:$0xff] }
  0x17   : > { %997 = vmatpush3.bf16.msra.mxu0 %v1081_v17  ;;  %v378_v17 = vld [vmem:[%s1356_s2] sm:$0x1] }
  0x18   : > { %998 = vmatprep.subr.bf16.mxu0 %v1084_v20  ;;  %773 = vmatprep.mubr.bf16.mxu1 %v398_v44 }
  0x19   : > { %1019 = vmatpush3.bf16.msra.mxu1 %v1083_v19 }
  0x1a   : > { %1020 = vmatprep.subr.bf16.mxu1 %v1086_v22 }
  0x1b   : > { %999 = vmatpush3.bf16.msra.mxu0 %v1085_v21 }
  0x1c   : > { %1000 = vmatprep.subr.bf16.mxu0 %v1088_v24 }
  0x1d   : > { %1021 = vmatpush3.bf16.msra.mxu1 %v1087_v23 }
  0x1e   : > { %1022 = vmatprep.subr.bf16.mxu1 %v1090_v26 }
  0x1f   : > { %1001 = vmatpush3.bf16.msra.mxu0 %v1089_v25 }
  0x20   : > { %1002 = vmatprep.subr.bf16.mxu0 %v1092_v29 }
  0x21   : > { %1023 = vmatpush3.bf16.msra.mxu1 %v1091_v28 }
  0x22   : > { %1024 = vmatprep.subr.bf16.mxu1 %v1094_v31  ;;  %v857_v31 = vld [vmem:[%s1358_s4] sm:$0xf] }
  0x23   : > { %1003 = vmatpush3.bf16.msra.mxu0 %v1093_v30  ;;  %v983_v30 = vld [vmem:[%s1359_s5] ss:$0 sm:$0xff] }
  0x24   : > { %1032 = vmatprep.subr.bf16.mxu0 %v1096_v37 }
  0x25   : > { %1025 = vmatpush3.bf16.msra.mxu1 %v1095_v34  ;;  %v859_v34 = vrot.slane %v857_v31, 7 }
  0x26   : > { %734 = vmatmul.mubr.bf16.vlgmr.msra.gmra.mrb[0].mxu0 %v389_v41 }
  0x27   : > { %1033 = vmatpush3.bf16.msra.mxu0 %v1098_v45  ;;  %813 = vmatprep.mubr.bf16.mxu0 %v406_v52 }
  0x28   : > { %774 = vmatmul.mubr.bf16.vlgmr.msra.gmra.mrb[0].mxu1 %v396_v42  ;;  %1034 = vmatprep.subr.bf16.mxu0 %v1099_v46 }
  0x2b   : > { %1035 = vmatpush3.bf16.msra.mxu0 %v1100_v47 }
  0x2c   : > { %1036 = vmatprep.subr.bf16.mxu0 %v1101_v48 }
  0x2f   : > { %1037 = vmatpush3.bf16.msra.mxu0 %v1102_v49 }
  0x30   : > { %1038 = vmatprep.subr.bf16.mxu0 %v1103_v51 }
  0x33   : > { %1039 = vmatpush3.bf16.msra.mxu0 %v1104_v53 }
  0x34   : > { %1040 = vmatprep.subr.bf16.mxu0 %v1105_v54 }
  0x37   : > { %1041 = vmatpush3.bf16.msra.mxu0 %v1106_v55 }
  0x38   : > { %1042 = vmatprep.subr.bf16.mxu0 %v1107_v56 }
  0x3b   : > { %1043 = vmatpush3.bf16.msra.mxu0 %v1108_v57 }
  0x3c   : > { %1044 = vmatprep.subr.bf16.mxu0 %v1109_v58 }
  0x3f   : > { %1045 = vmatpush3.bf16.msra.mxu0 %v1110_v59 }
  0x40   : > { %1046 = vmatprep.subr.bf16.mxu0 %v1111_v60 }
  0x43   : > { %1047 = vmatpush3.bf16.msra.mxu0 %v1112_v61 }
  0x46   : > { %814 = vmatmul.mubr.bf16.vlgmr.msra.gmra.mrb[4].mxu0 %v934_v50 }
  0xf9   : > { %v1004_v62 = vpop.f32.mrb[0].mxu0 }
  0xfa   : > { %v1005_v1 = vpop.f32.mrb[1].mxu0 }
  0xfb   : > { %v1026_v63 = vpop.f32.mrb[0].mxu1  ;;  %v1006_v3 = vadd.f32 %v1005_v1, %v1004_v62  ;;  %v1007_v4 = vpop.f32.mrb[2].mxu0 }
  0xfc   : > { %v1027_v2 = vpop.f32.mrb[1].mxu1  ;;  %v1008_v7 = vpop.f32.mrb[3].mxu0 }
  0xfd   : > { %v1028_v5 = vadd.f32 %v1027_v2, %v1026_v63  ;;  %v1029_v6 = vpop.f32.mrb[2].mxu1  ;;  %v736_v9 = vadd.f32 %v1006_v3, %v379_v0 }
  0xfe   : > { %v1030_v8 = vpop.f32.mrb[3].mxu1 }
  0xff   : > { %v776_v10 = vadd.f32 %v1028_v5, %v736_v9 }
 0x119   : > { %v1048_v11 = vpop.f32.mrb[4].mxu0 }
 0x11a   : > { %v1049_v12 = vpop.f32.mrb[5].mxu0 }
 0x11b   : > { %v1050_v13 = vadd.f32 %v1049_v12, %v1048_v11  ;;  %v1051_v14 = vpop.f32.mrb[6].mxu0 }
 0x11c   : > { %v1052_v15 = vpop.f32.mrb[7].mxu0 }
 0x11d   : > { %v816_v16 = vadd.f32 %v1050_v13, %v776_v10 }
 0x11f   : > { %v822_v18 = vrot.slane %v816_v16, 7 }
 0x121   : > { %v825_v19 = vsel %vm824_vm0, %v378_v17, %v822_v18 }
 0x122   : > { %v829_v20 = vsel %vm828_vm1, %v825_v19, 0.0 }
 0x123   : > { %830 = vadd.xlane.f32.xlu0 %v829_v20 }
 0x1b0   : > { %v831_v21 = vpop.xlane.xlu0 %830 }
 0x1b1   : > { %v833_v22 = vmul.f32 0.03125, %v831_v21 }
 0x1b3   : > { %v834_v23 = vsub.f32 %v825_v19, %v833_v22 }
 0x1b5   : > { %v835_v24 = vmul.f32 %v834_v23, %v834_v23 }
 0x1b7   : > { %v836_v25 = vsel %vm828_vm1, %v835_v24, 0.0 }
 0x1b8   : > { %837 = vadd.xlane.f32.xlu0 %v836_v25 }
 0x245   : > { %v838_v26 = vpop.xlane.xlu0 %837 }
 0x246   : > { %v839_v27 = vmul.f32 0.03125, %v838_v26 }
 0x248   : > { %v840_v28 = vadd.f32 1e-05, %v839_v27 }
 0x24a   : > { %1113 = vrsqrt.f32 %v840_v28 }
 0x254   : > { %v1114_v29 = vpop.eup %1113 }
 0x255   : > { %v842_v32 = vmul.f32 %v1114_v29, %v834_v23 }
 0x257   : > { %v849_v35 = vmul.f32 %v983_v30, %v842_v32 }
 0x259   : > { %v856_v36 = vadd.f32 %v984_v33, %v849_v35 }
 0x25b   : > { %v862_v37 = vrot.slane %v856_v36, 4  ;;  %v864_v38 = vsel %vm824_vm0, %v856_v36, %v859_v34 }
 0x25d   : > { %v866_v39 = vsel %vm865_vm2, %v864_v38, %v862_v37  ;;  %870 = vst.msk [vmem:[%s278_s11 + $0x8] sm:$0x1] %vm869_vm3, %v862_v37 }
 0x25e   : > { %868 = vst.msk [vmem:[%s278_s11] sm:$0xff] %vm867_vm4, %v866_v39 }
 0x25f PF: > { %s17_s24 = sadd.s32 1, %s1121_s24  }
 0x260   : > { %p14_p4 = scmp.ge.s32.totalorder %s17_s24, 4  }
 0x262   :  { %16 = sbr.rel (!%p14_p4) target bundleno = 1 (0x1), region = 78 }

// kernel: vpt_clip_vit_forward.6
= control target key start
LH: loop header
LB: loop body
LE: loop exit
PB: predicated region body
PF: predicated region fallthrough
CT: control target
= control target key end

     0   :  { %s2435_s18 = smov 0   ;;  %s2437_s19 = smov 0   ;;  %s2764_s0 = inlined_call_operand.vmem [shape: f32[2,9,32], index: 0, kind: input, shape index: {}]   ;;  %s2765_s1 = inlined_call_operand.vmem [shape: f32[4,4,32], index: 1, kind: input, shape index: {}]   ;;  %s2766_s2 = inlined_call_operand.vmem [shape: f32[4,1,32], index: 2, kind: input, shape index: {}]   ;;  %s2767_s3 = inlined_call_operand.vmem [shape: f32[4,1,32], index: 3, kind: input, shape index: {}]   ;;  %s2768_s4 = inlined_call_operand.vmem [shape: bf16[4,32,96], index: 4, kind: input, shape index: {}]   ;;  %s2769_s5 = inlined_call_operand.vmem [shape: f32[4,1,96], index: 5, kind: input, shape index: {}]   ;;  %s2770_s6 = inlined_call_operand.vmem [shape: bf16[4,32,32], index: 6, kind: input, shape index: {}]   ;;  %s2771_s7 = inlined_call_operand.vmem [shape: f32[4,1,32], index: 7, kind: input, shape index: {}]   ;;  %s2772_s8 = inlined_call_operand.vmem [shape: f32[4,1,32], index: 8, kind: input, shape index: {}]   ;;  %s2773_s9 = inlined_call_operand.vmem [shape: f32[4,1,32], index: 9, kind: input, shape index: {}]   ;;  %s2774_s10 = inlined_call_operand.vmem [shape: bf16[4,32,128], index: 10, kind: input, shape index: {}]   ;;  %s2775_s11 = inlined_call_operand.vmem [shape: f32[4,1,128], index: 11, kind: input, shape index: {}]   ;;  %s2776_s12 = inlined_call_operand.vmem [shape: bf16[4,128,32], index: 12, kind: input, shape index: {}]   ;;  %s2777_s13 = inlined_call_operand.vmem [shape: f32[4,1,32], index: 13, kind: input, shape index: {}]   ;;  %s2778_s14 = inlined_call_operand.vmem [shape: f32[2,9,32], index: 14, kind: output, shape index: {0}]   ;;  %s2779_s15 = inlined_call_operand.vmem [shape: f32[4,2,4,32], index: 15, kind: output, shape index: {1}]  }
   0x1   :  { %2784 = sst [smem:[#allocation8_spill]] %s2764_s0  ;;  %s2439_s20 = smov 0  }
   0x2   :  { %2785 = sst [smem:[#allocation9_spill]] %s2765_s1  ;;  %s2441_s21 = smov 0  }
   0x3   :  { %2786 = sst [smem:[#allocation10_spill]] %s2767_s3  ;;  %s2443_s22 = smov 0  }
   0x4   :  { %2787 = sst [smem:[#allocation11_spill]] %s2768_s4 }
   0x5   :  { %2788 = sst [smem:[#allocation12_spill]] %s2770_s6 }
   0x6   :  { %2789 = sst [smem:[#allocation13_spill]] %s2771_s7 }
   0x7   :  { %2790 = sst [smem:[#allocation14_spill]] %s2772_s8 }
   0x8   :  { %2791 = sst [smem:[#allocation15_spill]] %s2774_s10 }
   0x9   :  { %2792 = sst [smem:[#allocation16_spill]] %s2775_s11 }
   0xa   :  { %2793 = sst [smem:[#allocation17_spill]] %s2776_s12 }
   0xb   :  { %2794 = sst [smem:[#allocation18_spill]] %s2777_s13 }
   0xc   :  { %2795 = sst [smem:[#allocation19_spill]] %s2778_s14 }
   0xd   :  { %2796 = sst [smem:[#allocation20_spill]] %s2779_s15 }
   0xe LB: > { %2797 = sst [smem:[#allocation2_spill]] %s2320_s18  ;;  %s35_s23 = sadd.s32 1, %s2328_s20  ;;  %s2336_s22 = sphi %s2443_s22, %s26_s22   ;;  %s2332_s21 = sphi %s2441_s21, %s2833_s21   ;;  %s2328_s20 = sphi %s2439_s20, %s2832_s20   ;;  %s2324_s19 = sphi %s2437_s19, %s2831_s19   ;;  %s2320_s18 = sphi %s2435_s18, %s2830_s18  }
   0xf   : > { %2798 = sst [smem:[#allocation3_spill]] %s2328_s20  ;;  %s38_s24 = sadd.s32 1, %s2332_s21 }
  0x10   : > { %2799 = sst [smem:[#allocation4_spill]] %s2332_s21  ;;  %p36_p0 = scmp.ge.s32.totalorder %s35_s23, 4 }
  0x11   : > { %2800 = sst [smem:[#allocation5_spill]] %s2336_s22  ;;  %p1978_p1 = scmp.ge.s32.totalorder %s2336_s22, 1 }
  0x12   : > { %p567_p2 = scmp.lt.s32.totalorder %s2336_s22, 9  ;;  %s2835_s23 = smov (%p36_p0, %s35_s23), 0 }
  0x13   : > { %2801 = sst [smem:[#allocation6_spill]] %s2835_s23  ;;  %s2837_s24 = smov (!%p36_p0, %s38_s24), %s2332_s21 }
  0x14   : > { %p568_p3 = pnand %p1978_p1, %p567_p2  ;;  %p40_p4 = scmp.ge.s32.totalorder %s2837_s24, 2 }
  0x15   : > { %p671_p5 = scmp.lt.s32.totalorder (!%p568_p3), %s2324_s19, 1  ;;  %p676_p6 = scmp.lt.s32.totalorder (!%p568_p3), %s2320_s18, 3 }
  0x16   : > { %s2839_s24 = smov (%p40_p4, %s2837_s24), 0  ;;  %571 = sbr.rel (%p568_p3) target bundleno = 2613 (0xa35), region = 76 }
  0x17   : > { %2802 = sst [smem:[#allocation7_spill]] %s2839_s24  ;;  %s2803_s0 = sld [smem:[#allocation8_spill]] (!%p568_p3) }
  0x18   : > { %s2804_s1 = sld [smem:[#allocation9_spill]] (!%p568_p3)  ;;  %s2806_s4 = sld [smem:[#allocation11_spill]] (!%p568_p3) }
  0x19   : > { %s2807_s6 = sld [smem:[#allocation12_spill]] (!%p568_p3)  ;;  %s2810_s10 = sld [smem:[#allocation15_spill]] (!%p568_p3) }
  0x1a   : > { %s2816_s20 = sld [smem:[#allocation2_spill]] (!%p568_p3) }
  0x1d   : > { %s2841_s19 = smov (!%p671_p5, %s2324_s19), 1 }
  0x1e   : > { %s2469_s25 = scalar_select %p676_p6, %s2320_s18, 3 }
  0x1f   : > { %s2032_s26 = sshll.u32 %s2841_s19, 4  ;;  %s2812_s18 = sld [smem:[#allocation18_spill]] }
  0x20   : > { %s675_s29 = scalar_lea.vmem %s2803_s0, %s2032_s26  ;;  %s1981_s30 = sshll.u32 %s2469_s25, 2 }
  0x21   : > { %s2478_s24 = scalar_lea.vmem %s2804_s1, %s1981_s30  ;;  %s2033_s14 = sshll.u32 %s2469_s25, 4 }
  0x22   : > { %s2492_s28 = scalar_lea.vmem %s2806_s4, %s2033_s14  ;;  %s2501_s21 = scalar_lea.vmem %s2807_s6, %s2033_s14 }
  0x23   : > { %s2518_s13 = scalar_lea.vmem %s2810_s10, %s2033_s14  ;;  %s2036_s6 = sshll.u32 %s2469_s25, 6 }
  0x24   : > { %s2813_s1 = sld [smem:[#allocation17_spill]]  ;;  %s2814_s4 = sld [smem:[#allocation19_spill]] }
  0x25   : > { %s723_s7 = scalar_lea.vmem %s2812_s18, %s2469_s25  ;;  %s1992_s14 = sshll.u32 %s2469_s25, 1 }
  0x26   : > { %s734_s0 = sadd.s32 %s1992_s14, %s2841_s19  ;;  %s2815_s30 = sld [smem:[#allocation20_spill]] }
  0x27   : > { %s1993_s10 = sshll.u32 %s734_s0, 2  ;;  %p1994_p7 = scmp.ne.s32.totalorder %s2816_s20, 0 }
  0x28   : > { %v742_v0 = vld [vmem:[%s675_s29] sm:$0xff] (!%p1994_p7)  ;;  %vm744_vm0 = vcmask (!%p1994_p7), 261120   ;;  %v743_v1 = vld [vmem:[%s675_s29 + $0x8] sm:$0x1] (!%p1994_p7)  ;;  %vm746_vm1 = vcmask (!%p1994_p7), 253952  }
  0x29   : > { %741 = sbr.rel (%p1994_p7) target bundleno = 48 (0x30), region = 80 }
  0x2a   : > { %s2532_s8 = scalar_lea.vmem %s2813_s1, %s2036_s6  ;;  %s2537_s3 = scalar_lea.vmem %s2814_s4, %s2032_s26 }
  0x2b   : > { %745 = vst.msk [vmem:[%s2537_s3] sm:$0xff] (!%p1994_p7), %vm744_vm0, %v742_v0 }
  0x2c   : > { %s2543_s11 = scalar_lea.vmem %s2815_s30, %s1993_s10  ;;  %747 = vst.msk [vmem:[%s2537_s3 + $0x8] sm:$0x1] (!%p1994_p7), %vm746_vm1, %v743_v1 }
  0x30 PF: > { %v750_v3 = vld [vmem:[%s2478_s24] sm:$0xf]  ;;  %vm754_vm2 = vcmask 1040384   ;;  %vm756_vm3 = vcmask 1044480   ;;  %vm760_vm4 = vcmask 261120   ;;  %vm764_vm5 = vcmask 253952   ;;  %s2817_s6 = scalar_lea.vmem %s2766_s2, %s2469_s25  ;;  %s2820_s30 = scalar_lea.vmem %s2769_s5, %s2469_s25 }
  0x31   : > { %v752_v4 = vrot.slane %v750_v3, 7  ;;  %v2236_v20 = vld [vmem:[%s2492_s28] sm:$0xff]   ;;  %v2338_v21 = vmov 0.0   ;;  %v2237_v22 = vld [vmem:[%s2492_s28 + $0x8] sm:$0xff]   ;;  %vm2339_vm6 = vmmov 0   ;;  %s2818_s24 = sld [smem:[#allocation10_spill]] }
  0x32   : > { %v748_v2 = vld [vmem:[%s2537_s3] sm:$0xff]  ;;  %2072 = vmatprep.subr.bf16.mxu0 %v2338_v21  ;;  %2092 = vmatprep.subr.bf16.mxu1 %v2338_v21  ;;  %s2340_s18 = smov 88   ;;  %s2341_s23 = smov 96   ;;  %vm877_vm7 = vcmask 64512   ;;  %vm927_vm8 = vcmask 72704   ;;  %vm931_vm9 = vcmask 65536  }
  0x33   : > { %v2551_v5 = vld [vmem:[%s2537_s3 + $0x8] sm:$0x1]  ;;  %v755_v6 = vsel %vm754_vm2, %v748_v2, %v752_v4  ;;  %2073 = vmatpush3.bf16.msra.mxu0 %v2236_v20  ;;  %2076 = vmatprep.mubr.msk.bf16.mxu0 %vm2339_vm6, %v2338_v21  ;;  %v1995_v31 = vld [vmem:[%s2817_s6] ss:$0 sm:$0xff]  ;;  %s2342_s15 = smov 120   ;;  %s2343_s22 = smov 112  }
  0x34   : > { %v2554_v7 = vsel %vm756_vm3, %v755_v6, %v748_v2  ;;  %v765_v9 = vsel %vm764_vm5, %v2551_v5, 0.0  ;;  %2074 = vmatprep.subr.bf16.mxu0 %v2338_v21  ;;  %2094 = vmatprep.mubr.msk.bf16.mxu1 %vm2339_vm6, %v2338_v21  ;;  %v1997_v40 = vld [vmem:[%s2820_s30] ss:$0 sm:$0xff]  ;;  %s2344_s12 = smov 80   ;;  %s2345_s27 = smov 104   ;;  %vm957_vm10 = vcmask 1043456  }
  0x35   : > { %v761_v8 = vsel %vm760_vm4, %v2554_v7, 0.0  ;;  %s2346_s14 = smov 72   ;;  %s2347_s0 = smov 64   ;;  %vm1405_vm11 = vcmask 130048   ;;  %vm1408_vm12 = vcmask 195584   ;;  %vm1726_vm13 = vcmask 261125  }
  0x36   : > { %762 = vadd.xlane.f32.xlu0 %v761_v8  ;;  %s2349_s16 = smov 48   ;;  %s2350_s17 = smov 40  }
  0x37   : > { %2075 = vmatpush3.bf16.msra.mxu0 %v2237_v22  ;;  %s2819_s26 = scalar_lea.vmem %s2818_s24, %s2469_s25  ;;  %s2351_s20 = smov 56  }
  0x38   : > { %2080 = vmatprep.subr.bf16.mxu0 %v2338_v21  ;;  %v1996_v35 = vld [vmem:[%s2819_s26] ss:$0 sm:$0xff]  ;;  %s2352_s1 = smov 8   ;;  %s2353_s4 = smov 16  }
  0x39   : > { %s2354_s6 = smov 24   ;;  %s2821_s19 = sld [smem:[#allocation13_spill]] }
  0x3a   : > { %766 = vadd.xlane.f32.xlu0 %v765_v9  ;;  %s2823_s28 = sld [smem:[#allocation14_spill]] }
  0x3f   : > { %s2822_s24 = scalar_lea.vmem %s2821_s19, %s2469_s25 }
  0xc3   : > { %v763_v10 = vpop.xlane.xlu0 %762 }
  0xc4   : > { %v769_v11 = vmul.f32 0.03125, %v763_v10 }
  0xc6   : > { %v771_v12 = vsub.f32 %v2554_v7, %v769_v11 }
  0xc7   : > { %v767_v13 = vpop.xlane.xlu0 %766 }
  0xc8   : > { %v770_v14 = vmul.f32 0.03125, %v767_v13  ;;  %v773_v15 = vmul.f32 %v771_v12, %v771_v12 }
  0xca   : > { %v772_v16 = vsub.f32 %v2551_v5, %v770_v14  ;;  %v775_v17 = vsel %vm760_vm4, %v773_v15, 0.0 }
  0xcb   : > { %776 = vadd.xlane.f32.xlu1 %v775_v17 }
  0xcc   : > { %v774_v18 = vmul.f32 %v772_v16, %v772_v16 }
  0xce   : > { %v778_v19 = vsel %vm764_vm5, %v774_v18, 0.0 }
  0xcf   : > { %779 = vadd.xlane.f32.xlu1 %v778_v19 }
 0x158   : > { %v777_v23 = vpop.xlane.xlu1 %776 }
 0x159   : > { %v781_v24 = vmul.f32 0.03125, %v777_v23 }
 0x15b   : > { %v783_v25 = vadd.f32 1e-05, %v781_v24 }
 0x15c   : > { %v780_v26 = vpop.xlane.xlu1 %779 }
 0x15d   : > { %2250 = vrsqrt.f32 %v783_v25  ;;  %v782_v27 = vmul.f32 0.03125, %v780_v26 }
 0x15f   : > { %v784_v28 = vadd.f32 1e-05, %v782_v27 }
 0x161   : > { %2252 = vrsqrt.f32 %v784_v28 }
 0x167   : > { %v2251_v29 = vpop.eup %2250 }
 0x168   : > { %v787_v30 = vmul.f32 %v2251_v29, %v771_v12 }
 0x16a   : > { %v795_v34 = vmul.f32 %v1995_v31, %v787_v30 }
 0x16b   : > { %v2253_v32 = vpop.eup %2252 }
 0x16c   : > { %v788_v33 = vmul.f32 %v2253_v32, %v772_v16  ;;  %v803_v37 = vadd.f32 %v1996_v35, %v795_v34 }
 0x16e   : > { %v796_v36 = vmul.f32 %v1995_v31, %v788_v33 }
 0x170   : > { %v804_v38 = vadd.f32 %v1996_v35, %v796_v36 }
 0x172   : > { %v805_v39 = vpack.c.bf16 %v804_v38, %v803_v37 }
 0x174   : > { %2077 = vmatmul.mubr.msk.bf16.vlgmr.msra.gmra.mrb[0].mxu0 %vm760_vm4, %v805_v39 }
 0x175   : > { %2082 = vmatprep.mubr.msk.bf16.mxu0 %vm2339_vm6, %v2338_v21 }
 0x247   : > { %v866_v41 = vpop.f32.mrb[0].mxu0 }
 0x248   : > { %v2078_v42 = vpop.f32.mrb[1].mxu0  ;;  %v867_v44 = vadd.f32 %v1997_v40, %v866_v41 }
 0x249   : > { %v869_v43 = vpop.f32.mrb[2].mxu0 }
 0x24a   : > { %v870_v45 = vadd.f32 %v1997_v40, %v869_v43  ;;  %v2079_v46 = vpop.f32.mrb[3].mxu0 }
 0x24c   : > { %v2592_v47 = vpack.c.bf16 %v870_v45, %v867_v44 }
 0x24e   : > { %1006 = vrot.lane.b32.xlu1 %v2592_v47, %s2340_s18  ;;  %875 = vrot.lane.b32.xlu0 %v2592_v47, %s2341_s23  ;;  %s2825_s23 = scalar_lea.vmem %s2773_s9, %s2469_s25 }
 0x252   : > { %1004 = vrot.lane.b32.xlu1 %v2592_v47, %s2342_s15  ;;  %1129 = vrot.lane.b32.xlu0 %v2592_v47, %s2343_s22 }
 0x256   : > { %1131 = vrot.lane.b32.xlu1 %v2592_v47, %s2344_s12  ;;  %1254 = vrot.lane.b32.xlu0 %v2592_v47, %s2345_s27  ;;  %s2826_s12 = sld [smem:[#allocation16_spill]] }
 0x25a   : > { %1256 = vrot.lane.b32.xlu1 %v2592_v47, %s2346_s14 }
 0x25c   : > { %s2827_s27 = scalar_lea.vmem %s2826_s12, %s2469_s25 }
 0x2c0   : > { %v1007_v48 = vpop.permute.xlu1 %1006  ;;  %v876_v49 = vpop.permute.xlu0 %875 }
 0x2c1   : > { %v882_v50 = vsel %vm877_vm7, %v876_v49, 0  ;;  %v1012_v51 = vsel %vm877_vm7, %v1007_v48, 0  ;;  %v2348_v48 = vmov 65535  }
 0x2c2   : > { %2081 = vmatpush3.bf16.xpose.msra.mxu0 %v882_v50  ;;  %2093 = vmatpush3.bf16.xpose.msra.mxu1 %v1012_v51  ;;  %v958_v49 = vsel %vm957_vm10, 4294967295, %v2348_v48 }
 0x2c3   : > { %2104 = vmatprep.subr.bf16.mxu1 %v2338_v21  ;;  %2086 = vmatprep.subr.bf16.mxu0 %v2338_v21 }
 0x2c4   : > { %v1005_v52 = vpop.permute.xlu1 %1004  ;;  %v1130_v56 = vpop.permute.xlu0 %1129 }
 0x2c8   : > { %v1132_v53 = vpop.permute.xlu1 %1131  ;;  %v1255_v58 = vpop.permute.xlu0 %1254 }
 0x2c9   : > { %v1137_v54 = vsel %vm877_vm7, %v1132_v53, 0  ;;  %2083 = vmatmul.mubr.msk.bf16.vlgmr.msra.gmra.mrb[4].mxu0 %vm877_vm7, %v2592_v47  ;;  %2095 = vmatmul.mubr.msk.bf16.vlgmr.msra.gmra.mrb[0].mxu1 %vm877_vm7, %v1005_v52 }
 0x2ca   : > { %2105 = vmatpush3.bf16.xpose.msra.mxu1 %v1137_v54  ;;  %2106 = vmatprep.mubr.msk.bf16.mxu1 %vm2339_vm6, %v2338_v21 }
 0x2cb   : > { %2116 = vmatprep.subr.bf16.mxu1 %v2338_v21  ;;  %2088 = vmatprep.mubr.msk.bf16.mxu0 %vm2339_vm6, %v2338_v21 }
 0x2cc   : > { %v1257_v55 = vpop.permute.xlu1 %1256 }
 0x2cd   : > { %v1262_v57 = vsel %vm877_vm7, %v1257_v55, 0 }
 0x2d1   : > { %2107 = vmatmul.mubr.msk.bf16.vlgmr.msra.gmra.mrb[4].mxu1 %vm877_vm7, %v1130_v56 }
 0x2d2   : > { %2117 = vmatpush3.bf16.xpose.msra.mxu1 %v1262_v57  ;;  %2118 = vmatprep.mubr.msk.bf16.mxu1 %vm2339_vm6, %v2338_v21 }
 0x2d3   : > { %2128 = vmatprep.subr.bf16.mxu1 %v2338_v21 }
 0x2d9   : > { %2119 = vmatmul.mubr.msk.bf16.vlgmr.msra.gmra.mrb[8].mxu1 %vm877_vm7, %v1255_v58  ;;  %v2634_v58 = vsel %vm756_vm3, %v958_v49, 0 }
 0x2da   : > { %2132 = vmatprep.mubr.msk.bf16.mxu1 %vm2339_vm6, %v2338_v21 }
 0x39c   : > { %v918_v59 = vpop.f32.mrb[4].mxu0  ;;  %v1048_v60 = vpop.f32.mrb[0].mxu1 }
 0x39d   : > { %v925_v61 = vmul.f32 0.35355338, %v918_v59  ;;  %v2084_v62 = vpop.f32.mrb[5].mxu0  ;;  %v2096_v63 = vpop.f32.mrb[1].mxu1  ;;  %v1055_v8 = vmul.f32 0.35355338, %v1048_v60 }
 0x39e   : > { %v921_v0 = vpop.f32.mrb[6].mxu0  ;;  %v1051_v1 = vpop.f32.mrb[2].mxu1 }
 0x39f   : > { %v926_v2 = vmul.f32 0.35355338, %v921_v0  ;;  %v2085_v3 = vpop.f32.mrb[7].mxu0  ;;  %v2097_v4 = vpop.f32.mrb[3].mxu1  ;;  %v928_v6 = vsel %vm927_vm8, %v925_v61, -inf  ;;  %v1057_v14 = vsel %vm927_vm8, %v1055_v8, -inf }
 0x3a0   : > { %929 = vmax.xlane.f32.xlu1 %v928_v6  ;;  %v1056_v11 = vmul.f32 0.35355338, %v1051_v1 }
 0x3a1   : > { %v932_v9 = vsel %vm931_vm9, %v926_v2, -inf }
 0x3a2   : > { %933 = vmax.xlane.f32.xlu0 %v932_v9  ;;  %v1060_v19 = vsel %vm931_vm9, %v1056_v11, -inf }
 0x3a4   : > { %v1173_v10 = vpop.f32.mrb[4].mxu1 }
 0x3a5   : > { %v1180_v12 = vmul.f32 0.35355338, %v1173_v10  ;;  %v2108_v13 = vpop.f32.mrb[5].mxu1 }
 0x3a6   : > { %v1176_v15 = vpop.f32.mrb[6].mxu1  ;;  %1058 = vmax.xlane.f32.xlu0 %v1057_v14 }
 0x3a7   : > { %v2109_v16 = vpop.f32.mrb[7].mxu1  ;;  %v1182_v17 = vsel %vm927_vm8, %v1180_v12, -inf  ;;  %v1181_v18 = vmul.f32 0.35355338, %v1176_v15 }
 0x3a8   : > { %1183 = vmax.xlane.f32.xlu1 %v1182_v17 }
 0x3a9   : > { %v1185_v24 = vsel %vm931_vm9, %v1181_v18, -inf }
 0x3aa   : > { %1061 = vmax.xlane.f32.xlu0 %v1060_v19 }
 0x3ac   : > { %v1298_v20 = vpop.f32.mrb[8].mxu1 }
 0x3ad   : > { %v1305_v22 = vmul.f32 0.35355338, %v1298_v20  ;;  %v2120_v23 = vpop.f32.mrb[9].mxu1 }
 0x3ae   : > { %v1301_v25 = vpop.f32.mrb[10].mxu1  ;;  %1186 = vmax.xlane.f32.xlu0 %v1185_v24 }
 0x3af   : > { %v1306_v26 = vmul.f32 0.35355338, %v1301_v25  ;;  %v2121_v27 = vpop.f32.mrb[11].mxu1  ;;  %v1307_v28 = vsel %vm927_vm8, %v1305_v22, -inf }
 0x3b0   : > { %1308 = vmax.xlane.f32.xlu1 %v1307_v28 }
 0x3b1   : > { %v1310_v29 = vsel %vm931_vm9, %v1306_v26, -inf }
 0x3b2   : > { %1311 = vmax.xlane.f32.xlu0 %v1310_v29 }
 0x3c1   : > { %952 = vrot.lane.b32.xlu1 %v2592_v47, %s2347_s0 }
 0x42d   : > { %v930_v30 = vpop.xlane.xlu1 %929 }
 0x42e   : > { %v935_v31 = vsub.f32 %v925_v61, %v930_v30 }
 0x42f   : > { %v934_v32 = vpop.xlane.xlu0 %933 }
 0x430   : > { %v936_v33 = vsub.f32 %v926_v2, %v934_v32  ;;  %v937_v34 = vmul.f32 1.442695, %v935_v31 }
 0x432   : > { %v939_v35 = vmul.f32 1.442695, %v936_v33  ;;  %2254 = vpow2.f32 %v937_v34 }
 0x433   : > { %v1059_v36 = vpop.xlane.xlu0 %1058 }
 0x434   : > { %2256 = vpow2.f32 %v939_v35  ;;  %v1063_v37 = vsub.f32 %v1055_v8, %v1059_v36 }
 0x435   : > { %v1184_v38 = vpop.xlane.xlu1 %1183 }
 0x436   : > { %v1065_v39 = vmul.f32 1.442695, %v1063_v37  ;;  %v1188_v40 = vsub.f32 %v1180_v12, %v1184_v38 }
 0x437   : > { %v1062_v41 = vpop.xlane.xlu0 %1061 }
 0x438   : > { %2258 = vpow2.f32 %v1065_v39  ;;  %v1190_v42 = vmul.f32 1.442695, %v1188_v40  ;;  %v1064_v43 = vsub.f32 %v1056_v11, %v1062_v41 }
 0x43a   : > { %2260 = vpow2.f32 %v1190_v42  ;;  %v1067_v44 = vmul.f32 1.442695, %v1064_v43 }
 0x43b   : > { %v1187_v45 = vpop.xlane.xlu0 %1186 }
 0x43c   : > { %2262 = vpow2.f32 %v1067_v44  ;;  %v1189_v46 = vsub.f32 %v1181_v18, %v1187_v45  ;;  %v2255_v50 = vpop.eup %2254 }
 0x43d   : > { %v1309_v51 = vpop.xlane.xlu1 %1308  ;;  %v941_v55 = vsel %vm927_vm8, %v2255_v50, 0.0 }
 0x43e   : > { %v2257_v52 = vpop.eup %2256  ;;  %v1192_v53 = vmul.f32 1.442695, %v1189_v46  ;;  %v1313_v54 = vsub.f32 %v1305_v22, %v1309_v51  ;;  %942 = vadd.xlane.f32.xlu1 %v941_v55 }
 0x43f   : > { %v1312_v56 = vpop.xlane.xlu0 %1311  ;;  %v944_v57 = vsel %vm931_vm9, %v2257_v52, 0.0 }
 0x440   : > { %2264 = vpow2.f32 %v1192_v53  ;;  %v1315_v59 = vmul.f32 1.442695, %v1313_v54  ;;  %v1314_v60 = vsub.f32 %v1306_v26, %v1312_v56  ;;  %945 = vadd.xlane.f32.xlu0 %v944_v57  ;;  %v2238_v56 = vld [vmem:[%s2501_s21] sm:$0xff]  }
 0x441   : > { %v953_v61 = vpop.permute.xlu1 %952  ;;  %2129 = vmatpush3.bf16.msra.mxu1 %v2238_v56 }
 0x442   : > { %v2259_v62 = vpop.eup %2258  ;;  %2266 = vpow2.f32 %v1315_v59  ;;  %v1317_v63 = vmul.f32 1.442695, %v1314_v60  ;;  %v961_v0 = vand.u32 %v2634_v58, %v953_v61  ;;  %2130 = vmatprep.subr.bf16.mxu1 %v2338_v21  ;;  %v2239_v61 = vld [vmem:[%s2501_s21 + $0x8] sm:$0xff]  }
 0x443   : > { %v1069_v1 = vsel %vm927_vm8, %v2259_v62, 0.0 }
 0x444   : > { %v2638_v2 = vpop.eup %2260  ;;  %2087 = vmatpush3.bf16.msra.mxu0 %v961_v0  ;;  %1070 = vadd.xlane.f32.xlu1 %v1069_v1  ;;  %2268 = vpow2.f32 %v1317_v63 }
 0x445   : > { %2098 = vmatprep.subr.bf16.mxu0 %v2338_v21  ;;  %v1194_v4 = vsel %vm927_vm8, %v2638_v2, 0.0  ;;  %2131 = vmatpush3.bf16.msra.mxu1 %v2239_v61 }
 0x446   : > { %v2263_v3 = vpop.eup %2262  ;;  %2144 = vmatprep.subr.bf16.mxu1 %v2338_v21 }
 0x447   : > { %v1072_v6 = vsel %vm931_vm9, %v2263_v3, 0.0 }
 0x448   : > { %1195 = vadd.xlane.f32.xlu1 %v1194_v4  ;;  %1073 = vadd.xlane.f32.xlu0 %v1072_v6 }
 0x44a   : > { %v2265_v8 = vpop.eup %2264 }
 0x44b   : > { %v1197_v9 = vsel %vm931_vm9, %v2265_v8, 0.0 }
 0x44c   : > { %v2645_v10 = vpop.eup %2266  ;;  %1198 = vadd.xlane.f32.xlu0 %v1197_v9 }
 0x44d   : > { %v1319_v11 = vsel %vm927_vm8, %v2645_v10, 0.0 }
 0x44e   : > { %v2269_v12 = vpop.eup %2268 }
 0x44f   : > { %v1322_v13 = vsel %vm931_vm9, %v2269_v12, 0.0 }
 0x450   : > { %1320 = vadd.xlane.f32.xlu0 %v1319_v11 }
 0x454   : > { %1323 = vadd.xlane.f32.xlu0 %v1322_v13 }
 0x459   : > { %1205 = vrot.lane.b32.xlu1 %v2592_v47, %s2349_s16 }
 0x45d   : > { %1330 = vrot.lane.b32.xlu1 %v2592_v47, %s2350_s17 }
 0x46a   : > { %1080 = vrot.lane.b32.xlu0 %v2592_v47, %s2351_s20 }
 0x4cb   : > { %v943_v14 = vpop.xlane.xlu1 %942 }
 0x4cc   : > { %2270 = vrcp.f32 %v943_v14 }
 0x4cd   : > { %v946_v15 = vpop.xlane.xlu0 %945 }
 0x4ce   : > { %2272 = vrcp.f32 %v946_v15 }
 0x4d1   : > { %v1071_v18 = vpop.xlane.xlu1 %1070 }
 0x4d5   : > { %v1074_v16 = vpop.xlane.xlu0 %1073  ;;  %v1196_v47 = vpop.xlane.xlu1 %1195 }
 0x4d6   : > { %v2271_v17 = vpop.eup %2270  ;;  %2274 = vrcp.f32 %v1074_v16 }
 0x4d7   : > { %v949_v20 = vmul.f32 %v2271_v17, %v2255_v50  ;;  %2276 = vrcp.f32 %v1071_v18 }
 0x4d8   : > { %v2273_v19 = vpop.eup %2272 }
 0x4d9   : > { %v950_v22 = vmul.f32 %v2273_v19, %v2257_v52  ;;  %v1199_v23 = vpop.xlane.xlu0 %1198  ;;  %v1206_v33 = vpop.permute.xlu1 %1205 }
 0x4da   : > { %2278 = vrcp.f32 %v1199_v23  ;;  %v1211_v36 = vand.u32 %v1206_v33, %v2634_v58 }
 0x4db   : > { %v951_v24 = vpack.c.bf16 %v950_v22, %v949_v20  ;;  %2280 = vrcp.f32 %v1196_v47 }
 0x4dd   : > { %2089 = vmatmul.mubr.msk.bf16.vlgmr.msra.gmra.mrb[8].mxu0 %vm927_vm8, %v951_v24  ;;  %v1321_v25 = vpop.xlane.xlu0 %1320  ;;  %v1331_v40 = vpop.permute.xlu1 %1330 }
 0x4de   : > { %2100 = vmatprep.mubr.msk.bf16.mxu0 %vm2339_vm6, %v2338_v21  ;;  %v1336_v43 = vand.u32 %v1331_v40, %v2634_v58 }
 0x4e0   : > { %v2275_v27 = vpop.eup %2274 }
 0x4e1   : > { %v1324_v26 = vpop.xlane.xlu0 %1323  ;;  %v2277_v28 = vpop.eup %2276  ;;  %v1078_v29 = vmul.f32 %v2275_v27, %v2263_v3 }
 0x4e2   : > { %v1077_v32 = vmul.f32 %v2277_v28, %v2259_v62  ;;  %2282 = vrcp.f32 %v1324_v26 }
 0x4e3   : > { %2284 = vrcp.f32 %v1321_v25  ;;  %v2009_v25 = vld [vmem:[%s2822_s24] ss:$0 sm:$0xff] }
 0x4e4   : > { %v1079_v34 = vpack.c.bf16 %v1078_v29, %v1077_v32  ;;  %v2279_v35 = vpop.eup %2278 }
 0x4e5   : > { %v1081_v30 = vpop.permute.xlu0 %1080  ;;  %v2281_v37 = vpop.eup %2280  ;;  %v1203_v38 = vmul.f32 %v2279_v35, %v2265_v8 }
 0x4e6   : > { %v1086_v31 = vand.u32 %v1081_v30, %v2634_v58  ;;  %v1202_v39 = vmul.f32 %v2281_v37, %v2638_v2 }
 0x4e8   : > { %2099 = vmatpush3.bf16.msra.mxu0 %v1086_v31  ;;  %v1204_v41 = vpack.c.bf16 %v1203_v38, %v1202_v39 }
 0x4e9   : > { %2110 = vmatprep.subr.bf16.mxu0 %v2338_v21 }
 0x4eb   : > { %2101 = vmatmul.mubr.msk.bf16.vlgmr.msra.gmra.mrb[12].mxu0 %vm927_vm8, %v1079_v34 }
 0x4ec   : > { %2111 = vmatpush3.bf16.msra.mxu0 %v1211_v36  ;;  %2112 = vmatprep.mubr.msk.bf16.mxu0 %vm2339_vm6, %v2338_v21  ;;  %v2283_v42 = vpop.eup %2282 }
 0x4ed   : > { %2122 = vmatprep.subr.bf16.mxu0 %v2338_v21  ;;  %v2285_v44 = vpop.eup %2284  ;;  %v1328_v45 = vmul.f32 %v2283_v42, %v2269_v12 }
 0x4ee   : > { %v1327_v46 = vmul.f32 %v2285_v44, %v2645_v10  ;;  %v2241_v44 = vld [vmem:[%s2518_s13 + $0x8] sm:$0xff]  }
 0x4f0   : > { %v1329_v48 = vpack.c.bf16 %v1328_v45, %v1327_v46 }
 0x4f3   : > { %2113 = vmatmul.mubr.msk.bf16.vlgmr.msra.gmra.mrb[16].mxu0 %vm927_vm8, %v1204_v41 }
 0x4f4   : > { %2123 = vmatpush3.bf16.msra.mxu0 %v1336_v43  ;;  %2124 = vmatprep.mubr.msk.bf16.mxu0 %vm2339_vm6, %v2338_v21  ;;  %v2240_v43 = vld [vmem:[%s2518_s13] sm:$0xff]   ;;  %s2824_s13 = scalar_lea.vmem %s2823_s28, %s2469_s25 }
 0x4f5   : > { %2136 = vmatprep.subr.bf16.mxu0 %v2338_v21 }
 0x4fb   : > { %2125 = vmatmul.mubr.msk.bf16.vlgmr.msra.gmra.mrb[20].mxu0 %vm927_vm8, %v1329_v48 }
 0x4fc   : > { %2140 = vmatprep.mubr.msk.bf16.mxu0 %vm2339_vm6, %v2338_v21  ;;  %2137 = vmatpush3.bf16.msra.mxu0 %v2240_v43 }
 0x4fd   : > { %2138 = vmatprep.subr.bf16.mxu0 %v2338_v21 }
 0x500   : > { %2139 = vmatpush3.bf16.msra.mxu0 %v2241_v44 }
 0x5b0   : > { %v997_v49 = vpop.f32.mrb[8].mxu0 }
 0x5b1   : > { %v2090_v50 = vpop.f32.mrb[9].mxu0 }
 0x5b2   : > { %v1000_v51 = vpop.f32.mrb[10].mxu0 }
 0x5b3   : > { %v2091_v52 = vpop.f32.mrb[11].mxu0 }
 0x5be   : > { %v1122_v53 = vpop.f32.mrb[12].mxu0 }
 0x5bf   : > { %v2102_v54 = vpop.f32.mrb[13].mxu0 }
 0x5c0   : > { %v1125_v55 = vpop.f32.mrb[14].mxu0  ;;  %v2013_v54 = vld [vmem:[%s2824_s13] ss:$0 sm:$0xff] }
 0x5c1   : > { %v2221_v57 = vpack.i.bf16 %v1125_v55, %v1122_v53  ;;  %v2103_v58 = vpop.f32.mrb[15].mxu0 }
 0x5c2   : > { %v2014_v58 = vld [vmem:[%s2825_s23] ss:$0 sm:$0xff] }
 0x5c3   : > { %2222 = vrot.lane.b32.xlu1 %v2221_v57, %s2352_s1 }
 0x5c6   : > { %v1247_v59 = vpop.f32.mrb[16].mxu0 }
 0x5c7   : > { %v2114_v60 = vpop.f32.mrb[17].mxu0 }
 0x5c8   : > { %v1250_v62 = vpop.f32.mrb[18].mxu0 }
 0x5c9   : > { %v2226_v63 = vpack.i.bf16 %v1250_v62, %v1247_v59  ;;  %v2115_v0 = vpop.f32.mrb[19].mxu0 }
 0x5ca   : > { %v2243_v0 = vld [vmem:[%s2532_s8 + $0x8] sm:$0xff]  }
 0x5cb   : > { %2227 = vrot.lane.b32.xlu1 %v2226_v63, %s2353_s4  ;;  %v2242_v63 = vld [vmem:[%s2532_s8] sm:$0xff]  }
 0x5ce   : > { %v1372_v1 = vpop.f32.mrb[20].mxu0 }
 0x5cf   : > { %v2126_v2 = vpop.f32.mrb[21].mxu0 }
 0x5d0   : > { %v1375_v3 = vpop.f32.mrb[22].mxu0  ;;  %v2245_v2 = vld [vmem:[%s2532_s8 + $0x18] sm:$0xff]  }
 0x5d1   : > { %v2231_v4 = vpack.i.bf16 %v1375_v3, %v1372_v1  ;;  %v2127_v6 = vpop.f32.mrb[23].mxu0  ;;  %v2244_v1 = vld [vmem:[%s2532_s8 + $0x10] sm:$0xff]   ;;  %v2246_v3 = vld [vmem:[%s2532_s8 + $0x20] sm:$0xff]  }
 0x5d2   : > { %v2248_v6 = vld [vmem:[%s2532_s8 + $0x30] sm:$0xff]  }
 0x5d3   : > { %2232 = vrot.lane.b32.xlu1 %v2231_v4, %s2354_s6  ;;  %v2247_v4 = vld [vmem:[%s2532_s8 + $0x28] sm:$0xff]  }
 0x635   : > { %v2223_v8 = vpop.permute.xlu1 %2222 }
 0x636   : > { %v2225_v10 = vunpack.i.h.bf16 %v2223_v8  ;;  %v2224_v11 = vunpack.i.l.bf16 %v2223_v8  ;;  %v2249_v8 = vld [vmem:[%s2532_s8 + $0x38] sm:$0xff]  }
 0x638   : > { %v1404_v15 = vsel %vm877_vm7, %v1000_v51, %v2225_v10  ;;  %v1403_v16 = vsel %vm877_vm7, %v997_v49, %v2224_v11 }
 0x63d   : > { %v2228_v9 = vpop.permute.xlu1 %2227 }
 0x63e   : > { %v2230_v12 = vunpack.i.h.bf16 %v2228_v9  ;;  %v2229_v13 = vunpack.i.l.bf16 %v2228_v9  ;;  %v2015_v9 = vld [vmem:[%s2827_s27] ss:$0 sm:$0xff] }
 0x640   : > { %v1407_v19 = vsel %vm1405_vm11, %v1404_v15, %v2230_v12  ;;  %v1406_v20 = vsel %vm1405_vm11, %v1403_v16, %v2229_v13 }
 0x645   : > { %v2233_v14 = vpop.permute.xlu1 %2232 }
 0x646   : > { %v2235_v17 = vunpack.i.h.bf16 %v2233_v14  ;;  %v2234_v18 = vunpack.i.l.bf16 %v2233_v14 }
 0x648   : > { %v1410_v22 = vsel %vm1408_vm12, %v1407_v19, %v2235_v17  ;;  %v1409_v23 = vsel %vm1408_vm12, %v1406_v20, %v2234_v18 }
 0x649   : > { %v1411_v24 = vpack.c.bf16 %v1410_v22, %v1409_v23 }
 0x64b   : > { %2133 = vmatmul.mubr.msk.bf16.vlgmr.msra.gmra.mrb[12].mxu1 %vm760_vm4, %v1411_v24 }
 0x64c   : > { %2160 = vmatprep.mubr.msk.bf16.mxu1 %vm2339_vm6, %v2338_v21  ;;  %2145 = vmatpush3.bf16.msra.mxu1 %v2242_v63 }
 0x64d   : > { %2146 = vmatprep.subr.bf16.mxu1 %v2338_v21 }
 0x650   : > { %2147 = vmatpush3.bf16.msra.mxu1 %v2243_v0 }
 0x651   : > { %2148 = vmatprep.subr.bf16.mxu1 %v2338_v21 }
 0x654   : > { %2149 = vmatpush3.bf16.msra.mxu1 %v2244_v1 }
 0x655   : > { %2150 = vmatprep.subr.bf16.mxu1 %v2338_v21 }
 0x658   : > { %2151 = vmatpush3.bf16.msra.mxu1 %v2245_v2 }
 0x659   : > { %2152 = vmatprep.subr.bf16.mxu1 %v2338_v21 }
 0x65c   : > { %2153 = vmatpush3.bf16.msra.mxu1 %v2246_v3 }
 0x65d   : > { %2154 = vmatprep.subr.bf16.mxu1 %v2338_v21 }
 0x660   : > { %2155 = vmatpush3.bf16.msra.mxu1 %v2247_v4 }
 0x661   : > { %2156 = vmatprep.subr.bf16.mxu1 %v2338_v21 }
 0x664   : > { %2157 = vmatpush3.bf16.msra.mxu1 %v2248_v6 }
 0x665   : > { %2158 = vmatprep.subr.bf16.mxu1 %v2338_v21 }
 0x668   : > { %2159 = vmatpush3.bf16.msra.mxu1 %v2249_v8 }
 0x71e   : > { %v1472_v47 = vpop.f32.mrb[12].mxu1 }
 0x71f   : > { %v1473_v26 = vadd.f32 %v2009_v25, %v1472_v47  ;;  %v2134_v27 = vpop.f32.mrb[13].mxu1 }
 0x720   : > { %v1475_v28 = vpop.f32.mrb[14].mxu1 }
 0x721   : > { %v2688_v29 = vadd.f32 %v1473_v26, %v2554_v7  ;;  %v1476_v30 = vadd.f32 %v2009_v25, %v1475_v28  ;;  %v2135_v31 = vpop.f32.mrb[15].mxu1  ;;  %v2021_v28 = vld [vmem:[%s723_s7] ss:$0 sm:$0xff] }
 0x723   : > { %v2691_v32 = vadd.f32 %v1476_v30, %v2551_v5  ;;  %v1483_v33 = vsel %vm760_vm4, %v2688_v29, 0.0 }
 0x724   : > { %1484 = vadd.xlane.f32.xlu0 %v1483_v33 }
 0x725   : > { %v1486_v34 = vsel %vm764_vm5, %v2691_v32, 0.0 }
 0x726   : > { %1487 = vadd.xlane.f32.xlu1 %v1486_v34 }
 0x7b1   : > { %v1485_v35 = vpop.xlane.xlu0 %1484 }
 0x7b2   : > { %v1489_v36 = vmul.f32 0.03125, %v1485_v35 }
 0x7b3   : > { %v1488_v37 = vpop.xlane.xlu1 %1487 }
 0x7b4   : > { %v1491_v7 = vsub.f32 %v2688_v29, %v1489_v36  ;;  %v1490_v38 = vmul.f32 0.03125, %v1488_v37 }
 0x7b6   : > { %v1492_v39 = vsub.f32 %v2691_v32, %v1490_v38  ;;  %v1493_v5 = vmul.f32 %v1491_v7, %v1491_v7 }
 0x7b8   : > { %v1495_v40 = vsel %vm760_vm4, %v1493_v5, 0.0  ;;  %v1494_v41 = vmul.f32 %v1492_v39, %v1492_v39 }
 0x7b9   : > { %1496 = vadd.xlane.f32.xlu0 %v1495_v40 }
 0x7ba   : > { %v1498_v42 = vsel %vm764_vm5, %v1494_v41, 0.0 }
 0x7bd   : > { %1499 = vadd.xlane.f32.xlu0 %v1498_v42 }
 0x846   : > { %v1497_v45 = vpop.xlane.xlu0 %1496 }
 0x847   : > { %v1501_v46 = vmul.f32 0.03125, %v1497_v45 }
 0x849   : > { %v1503_v48 = vadd.f32 1e-05, %v1501_v46 }
 0x84a   : > { %v1500_v49 = vpop.xlane.xlu0 %1499 }
 0x84b   : > { %2286 = vrsqrt.f32 %v1503_v48  ;;  %v1502_v50 = vmul.f32 0.03125, %v1500_v49 }
 0x84d   : > { %v1504_v51 = vadd.f32 1e-05, %v1502_v50 }
 0x84f   : > { %2288 = vrsqrt.f32 %v1504_v51 }
 0x855   : > { %v2287_v52 = vpop.eup %2286 }
 0x856   : > { %v1507_v53 = vmul.f32 %v2287_v52, %v1491_v7 }
 0x858   : > { %v1515_v56 = vmul.f32 %v2013_v54, %v1507_v53 }
 0x859   : > { %v2289_v55 = vpop.eup %2288 }
 0x85a   : > { %v1508_v57 = vmul.f32 %v2289_v55, %v1492_v39  ;;  %v1523_v60 = vadd.f32 %v2014_v58, %v1515_v56 }
 0x85c   : > { %v1516_v59 = vmul.f32 %v2013_v54, %v1508_v57 }
 0x85e   : > { %v1524_v61 = vadd.f32 %v2014_v58, %v1516_v59 }
 0x860   : > { %v1525_v62 = vpack.c.bf16 %v1524_v61, %v1523_v60 }
 0x862   : > { %2141 = vmatmul.mubr.msk.bf16.vlgmr.msra.gmra.mrb[24].mxu0 %vm760_vm4, %v1525_v62 }
 0x935   : > { %v1586_v10 = vpop.f32.mrb[24].mxu0 }
 0x936   : > { %v1587_v11 = vadd.f32 %v2015_v9, %v1586_v10  ;;  %v2142_v12 = vpop.f32.mrb[25].mxu0 }
 0x937   : > { %v1589_v13 = vpop.f32.mrb[26].mxu0 }
 0x938   : > { %v2019_v14 = vmul.f32 -1.702, %v1587_v11  ;;  %v1590_v15 = vadd.f32 %v2015_v9, %v1589_v13  ;;  %v2143_v16 = vpop.f32.mrb[27].mxu0 }
 0x93a   : > { %v1597_v17 = vmul.f32 1.442695, %v2019_v14  ;;  %v2020_v18 = vmul.f32 -1.702, %v1590_v15 }
 0x93c   : > { %2290 = vpow2.f32 %v1597_v17  ;;  %v1599_v19 = vmul.f32 1.442695, %v2020_v18 }
 0x93e   : > { %2292 = vpow2.f32 %v1599_v19 }
 0x946   : > { %v2291_v21 = vpop.eup %2290 }
 0x947   : > { %v1601_v20 = vadd.f32 1.0, %v2291_v21 }
 0x948   : > { %v2293_v22 = vpop.eup %2292 }
 0x949   : > { %2294 = vrcp.f32 %v1601_v20  ;;  %v1602_v23 = vadd.f32 1.0, %v2293_v22 }
 0x94b   : > { %2296 = vrcp.f32 %v1602_v23 }
 0x953   : > { %v2295_v24 = vpop.eup %2294 }
 0x954   : > { %v1607_v47 = vmul.f32 %v2295_v24, %v1587_v11 }
 0x955   : > { %v2297_v25 = vpop.eup %2296 }
 0x956   : > { %v1608_v26 = vmul.f32 %v2297_v25, %v1590_v15 }
 0x958   : > { %v1609_v27 = vpack.c.bf16 %v1608_v26, %v1607_v47 }
 0x95a   : > { %2161 = vmatmul.mubr.bf16.vlgmr.msra.gmra.mrb[16].mxu1 %v1609_v27 }
 0xa2d   : > { %v1715_v30 = vpop.f32.mrb[16].mxu1 }
 0xa2e   : > { %v1716_v31 = vadd.f32 %v2021_v28, %v1715_v30  ;;  %v2162_v33 = vpop.f32.mrb[17].mxu1 }
 0xa2f   : > { %v1718_v34 = vpop.f32.mrb[18].mxu1 }
 0xa30   : > { %v1722_v35 = vadd.f32 %v1716_v31, %v2688_v29  ;;  %v1719_v36 = vadd.f32 %v2021_v28, %v1718_v34  ;;  %v2163_v37 = vpop.f32.mrb[19].mxu1 }
 0xa32   : > { %1724 = vst.msk [vmem:[%s2537_s3] sm:$0xff] %vm760_vm4, %v1722_v35  ;;  %v1723_v7 = vadd.f32 %v1719_v36, %v2691_v32 }
 0xa33   : > { %1727 = vst.msk [vmem:[%s2543_s11 - $0x5] sm:$0xe0] %vm1726_vm13, %v1722_v35 }
 0xa34   : > { %1725 = vst.msk [vmem:[%s2537_s3 + $0x8] sm:$0x1] %vm764_vm5, %v1723_v7  ;;  %1728 = vst.msk [vmem:[%s2543_s11 + $0x3] sm:$0x1] %vm764_vm5, %v1723_v7 }
 0xa35 PF: > { %s2829_s7 = sld [smem:[#allocation5_spill]]  ;;  %s2830_s18 = sld [smem:[#allocation3_spill]] }
 0xa36   : > { %s2831_s19 = sld [smem:[#allocation4_spill]]  ;;  %s2832_s20 = sld [smem:[#allocation6_spill]] }
 0xa37   : > { %s2833_s21 = sld [smem:[#allocation7_spill]] }
 0xa3b   : > { %s26_s22 = sadd.s32 1, %s2829_s7  }
 0xa3c   : > { %p23_p8 = scmp.ge.s32.totalorder %s26_s22, 10  }
 0xa3e   :  { %25 = sbr.rel (!%p23_p8) target bundleno = 14 (0xe), region = 161 }

</bundles_post_ra>
